<compile_context>
chip_gen: v7x
topology: tpu7x:2x2x1
jax: 0.10.0
libtpu: 0.0.40
codegen_flags: <defaults>
</compile_context>

<pallas_src>
import functools

import jax
import jax.numpy as jnp
from jax.experimental import pallas as pl
from jax.experimental.pallas import tpu as pltpu


# ------------------------------- kernel --------------------------------------
def qc_swiglu_kernel(xa_ref, xb_ref, wgu_a_ref, wgu_b_ref, bgu_ref,
                     wd_a_ref, wd_b_ref, bd_ref, out_ref, *, approx_sigmoid):
    # gate+up projection: split over the x_a / x_b rows of the folded weight,
    # two wide MXU matmuls with f32 accumulation.
    gu = jnp.dot(xa_ref[...], wgu_a_ref[...], preferred_element_type=jnp.float32)
    gu = gu + jnp.dot(xb_ref[...], wgu_b_ref[...],
                      preferred_element_type=jnp.float32)
    gu = gu + bgu_ref[...]                       # f32 biases

    h = gu.shape[1] // 4                         # padded hidden (multiple of 128)
    gate_a = gu[:, 0 * h:1 * h]
    gate_b = gu[:, 1 * h:2 * h]
    up_a = gu[:, 2 * h:3 * h]
    up_b = gu[:, 3 * h:4 * h]

    # SwiGLU gating on the QC magnitude (f32 elementwise math).
    mag = jnp.sqrt(gate_a * gate_a + gate_b * gate_b + 1e-8)
    if approx_sigmoid:
        sig = pl.reciprocal(1.0 + jnp.exp(-mag), approx=True)   # EUP path
    else:
        sig = jax.nn.sigmoid(mag)
    act = mag * sig                              # SiLU(|gate|)

    # dropout -> identity (eval mode)
    gated_a = (act * up_a).astype(wd_a_ref.dtype)
    gated_b = (act * up_b).astype(wd_b_ref.dtype)

    # down projection: split-K, MXU accumulates the two partials.
    out = jnp.dot(gated_a, wd_a_ref[...], preferred_element_type=jnp.float32)
    out = out + jnp.dot(gated_b, wd_b_ref[...],
                        preferred_element_type=jnp.float32)
    out_ref[...] = (out + bd_ref[...]).astype(out_ref.dtype)


# ------------------------------- helpers --------------------------------------
def _round_up(x, m):
    return ((x + m - 1) // m) * m


def _pad2(w, rows, cols):
    return jnp.pad(w, ((0, rows - w.shape[0]), (0, cols - w.shape[1])))


def _pad1(v, n):
    return jnp.pad(v, (0, n - v.shape[0]))


def _vmem_capacity_bytes():
    try:
        return int(pltpu.get_tpu_info().vmem_capacity_bytes)
    except Exception:
        return 64 << 20          # conservative: v7x per-TensorCore VMEM


def _qc_swiglu_jax_fallback(x_a, x_b, theta, params):
    """Pure-JAX path (also used as reference)."""
    j2 = -1.0 + jnp.sin(2.0 * theta)

    def qclinear(a, b, wa, wb, ba, bb):
        out_a = a @ wa.T + ba + j2 * (b @ wb.T)
        out_b = a @ wb.T + bb + b @ wa.T
        return out_a, out_b

    ga, gb = qclinear(x_a, x_b, params["wg_a"], params["wg_b"],
                      params["bg_a"], params["bg_b"])
    ua, ub = qclinear(x_a, x_b, params["wu_a"], params["wu_b"],
                      params["bu_a"], params["bu_b"])
    mag = jnp.sqrt(ga ** 2 + gb ** 2 + 1e-8)
    act = mag * jax.nn.sigmoid(mag)
    return qclinear(act * ua, act * ub, params["wd_a"], params["wd_b"],
                    params["bd_a"], params["bd_b"])


# ------------------------------- wrapper --------------------------------------
def qc_matrix_swiglu(x_a, x_b, theta, params, *, tile_m=256,
                     compute_dtype=jnp.bfloat16):
    """Fused QCMatrixSwiGLU forward.  x_a, x_b: (B, S, D). theta: scalar."""
    B, S, D = x_a.shape
    H = params["wg_a"].shape[0]
    M = B * S
    f32 = jnp.float32
    cdt = jnp.dtype(compute_dtype)

    # ---- TPU-friendly padded sizes -------------------------------------------
    Dp = _round_up(D, 64)          # 2*Dp multiple of 128 -> lane-dense out slab
    Hp = _round_up(H, 128)         # gate/up slices on 128-lane boundaries
    row_align = 16 if cdt == jnp.dtype(jnp.bfloat16) else 8
    tm = min(int(tile_m), _round_up(M, row_align))
    Mp = _round_up(M, tm)
    # v7x megacore: prefer >= 2 grid steps when there are enough rows.
    if Mp // tm < 2 and M >= 256:
        tm = max(row_align, _round_up(-(-M // 2), row_align))
        Mp = _round_up(M, tm)
    grid = (Mp // tm,)

    # j^2 = -1 + sin(2*theta)  (known before the pallas_call -> fold into weights)
    j2 = -1.0 + jnp.sin(2.0 * jnp.asarray(theta, f32))

    # ---- activations: cast to compute dtype BEFORE pad (no f32 HBM pass) ------
    xa = _pad2(x_a.reshape(M, D).astype(compute_dtype), Mp, Dp)   # (Mp, Dp)
    xb = _pad2(x_b.reshape(M, D).astype(compute_dtype), Mp, Dp)   # (Mp, Dp)

    # ---- fold the QC structure into block-concatenated weights ----------------
    wga = _pad2(params["wg_a"].T.astype(f32), Dp, Hp)
    wgb = _pad2(params["wg_b"].T.astype(f32), Dp, Hp)
    wua = _pad2(params["wu_a"].T.astype(f32), Dp, Hp)
    wub = _pad2(params["wu_b"].T.astype(f32), Dp, Hp)
    # columns: [gate_a | gate_b | up_a | up_b]; rows split by x_a / x_b source.
    w_gu_a = jnp.concatenate([wga, wgb, wua, wub],
                             axis=1).astype(compute_dtype)          # (Dp, 4*Hp)
    w_gu_b = jnp.concatenate([j2 * wgb, wga, j2 * wub, wua],
                             axis=1).astype(compute_dtype)          # (Dp, 4*Hp)

    b_gu = jnp.concatenate([
        _pad1(params["bg_a"].astype(f32), Hp), _pad1(params["bg_b"].astype(f32), Hp),
        _pad1(params["bu_a"].astype(f32), Hp), _pad1(params["bu_b"].astype(f32), Hp),
    ]).reshape(1, 4 * Hp)                                           # f32

    wda = _pad2(params["wd_a"].T.astype(f32), Hp, Dp)
    wdb = _pad2(params["wd_b"].T.astype(f32), Hp, Dp)
    # columns: [out_a | out_b]; rows split by gated_a / gated_b source.
    w_d_a = jnp.concatenate([wda, wdb], axis=1).astype(compute_dtype)       # (Hp, 2*Dp)
    w_d_b = jnp.concatenate([j2 * wdb, wda], axis=1).astype(compute_dtype)  # (Hp, 2*Dp)

    b_d = jnp.concatenate([
        _pad1(params["bd_a"].astype(f32), Dp), _pad1(params["bd_b"].astype(f32), Dp),
    ]).reshape(1, 2 * Dp)                                           # f32

    # ---- per-generation VMEM budget -------------------------------------------
    bpe = cdt.itemsize
    w_bytes = (w_gu_a.size + w_gu_b.size + w_d_a.size + w_d_b.size) * bpe \
        + (b_gu.size + b_d.size) * 4
    tile_in = 2 * tm * Dp * bpe                       # xa + xb tiles (compute dtype)
    tile_out = tm * 2 * Dp * 4                        # f32 out tile
    inter = tm * 4 * Hp * 4 + tm * 2 * Hp * (4 + bpe)  # gu slab + gated slabs

    capacity = _vmem_capacity_bytes()
    budget = capacity - (8 << 20)                     # headroom for Mosaic scratch

    # Scalability guard: fully-resident weights only fit small models.
    if w_bytes + inter + 2 * (tile_in + tile_out) > budget:
        # TODO(synk): add an Hp-tiled 'arbitrary' grid axis for large D/H.
        return _qc_swiglu_jax_fallback(x_a, x_b, theta, params)

    kernel = functools.partial(
        qc_swiglu_kernel,
        approx_sigmoid=(cdt != jnp.dtype(jnp.float32)))

    x_spec = pl.BlockSpec((tm, Dp), lambda i: (i, 0))
    out_spec = pl.BlockSpec((tm, 2 * Dp), lambda i: (i, 0))

    def make_call(single_buffer):
        if single_buffer:
            kw = dict(pipeline_mode=pl.Buffered(1))   # resident: single buffer
            w_mult = 1
        else:
            kw = {}
            w_mult = 2
        resident_specs = [
            pl.BlockSpec((Dp, 4 * Hp), lambda i: (0, 0), **kw),   # w_gu_a
            pl.BlockSpec((Dp, 4 * Hp), lambda i: (0, 0), **kw),   # w_gu_b
            pl.BlockSpec((1, 4 * Hp), lambda i: (0, 0), **kw),    # b_gu
            pl.BlockSpec((Hp, 2 * Dp), lambda i: (0, 0), **kw),   # w_d_a
            pl.BlockSpec((Hp, 2 * Dp), lambda i: (0, 0), **kw),   # w_d_b
            pl.BlockSpec((1, 2 * Dp), lambda i: (0, 0), **kw),    # b_d
        ]
        vmem_est = (w_mult * w_bytes + 2 * (tile_in + tile_out)
                    + inter + (4 << 20))
        vmem_limit = int(min(max(vmem_est, 32 << 20), budget))
        return pl.pallas_call(
            kernel,
            out_shape=jax.ShapeDtypeStruct((Mp, 2 * Dp), f32),
            grid=grid,
            in_specs=[x_spec, x_spec] + resident_specs,
            out_specs=out_spec,
            compiler_params=pltpu.CompilerParams(
                dimension_semantics=("parallel",),
                vmem_limit_bytes=vmem_limit),
        )

    args = (xa, xb, w_gu_a, w_gu_b, b_gu, w_d_a, w_d_b, b_d)
    try:
        out = jax.block_until_ready(make_call(True)(*args))
    except Exception:
        # JAX build without single-buffer pipeline_mode support: fall back to
        # default double-buffered resident operands (identical results).
        out = jax.block_until_ready(make_call(False)(*args))

    out_a = out[:M, :D].reshape(B, S, D)
    out_b = out[:M, Dp:Dp + D].reshape(B, S, D)
    return out_a, out_b


# -------------------------- pure-JAX reference -------------------------------
def qc_matrix_swiglu_ref(x_a, x_b, theta, params):
    return _qc_swiglu_jax_fallback(x_a, x_b, theta, params)


def xavier_uniform(key, out_f, in_f):
    bound = (6.0 / (in_f + out_f)) ** 0.5
    return jax.random.uniform(key, (out_f, in_f), jnp.float32, -bound, bound)


if __name__ == "__main__":
    B, S, DIM, HID = 2, 8, 32, 64

    key = jax.random.PRNGKey(0)
    keys = jax.random.split(key, 10)

    params = {
        "wg_a": xavier_uniform(keys[0], HID, DIM),
        "wg_b": xavier_uniform(keys[1], HID, DIM),
        "bg_a": jnp.zeros((HID,), jnp.float32),
        "bg_b": jnp.zeros((HID,), jnp.float32),
        "wu_a": xavier_uniform(keys[2], HID, DIM),
        "wu_b": xavier_uniform(keys[3], HID, DIM),
        "bu_a": jnp.zeros((HID,), jnp.float32),
        "bu_b": jnp.zeros((HID,), jnp.float32),
        "wd_a": xavier_uniform(keys[4], DIM, HID),
        "wd_b": xavier_uniform(keys[5], DIM, HID),
        "bd_a": jnp.zeros((DIM,), jnp.float32),
        "bd_b": jnp.zeros((DIM,), jnp.float32),
    }

    x_a = jax.random.normal(keys[6], (B, S, DIM), jnp.float32)
    x_b = jax.random.normal(keys[7], (B, S, DIM), jnp.float32)
    theta = jnp.float32(0.3)

    ref_a, ref_b = qc_matrix_swiglu_ref(x_a, x_b, theta, params)

    # ---- bf16 matmul path (default, fast): check relative L2 error ----------
    out_a, out_b = qc_matrix_swiglu(x_a, x_b, theta, params,
                                    compute_dtype=jnp.bfloat16)
    jax.block_until_ready((out_a, out_b))
    err_a = jnp.linalg.norm(out_a - ref_a) / (jnp.linalg.norm(ref_a) + 1e-12)
    err_b = jnp.linalg.norm(out_b - ref_b) / (jnp.linalg.norm(ref_b) + 1e-12)
    assert float(err_a) < 2e-2, f"bf16 path rel L2 error too large: {float(err_a)}"
    assert float(err_b) < 2e-2, f"bf16 path rel L2 error too large: {float(err_b)}"

    # ---- f32 matmul path: tight elementwise check ----------------------------
    out_a32, out_b32 = qc_matrix_swiglu(x_a, x_b, theta, params,
                                        compute_dtype=jnp.float32)
    jax.block_until_ready((out_a32, out_b32))
    assert jnp.allclose(out_a32, ref_a, atol=1e-3, rtol=1e-3)
    assert jnp.allclose(out_b32, ref_b, atol=1e-3, rtol=1e-3)

    print("KERNEL_OK")
</pallas_src>

<mosaic_0001>
module attributes {stable_mosaic.version = 11 : i64} {
  func.func @qc_swiglu_kernel(%arg0: i32, %arg1: memref<16x64xbf16, #tpu.memory_space<vmem>>, %arg2: memref<16x64xbf16, #tpu.memory_space<vmem>>, %arg3: memref<64x512xbf16, #tpu.memory_space<vmem>>, %arg4: memref<64x512xbf16, #tpu.memory_space<vmem>>, %arg5: memref<1x512xf32, #tpu.memory_space<vmem>>, %arg6: memref<128x128xbf16, #tpu.memory_space<vmem>>, %arg7: memref<128x128xbf16, #tpu.memory_space<vmem>>, %arg8: memref<1x128xf32, #tpu.memory_space<vmem>>, %arg9: memref<16x128xf32, #tpu.memory_space<vmem>>) attributes {dimension_semantics = [#tpu.dimension_semantics<parallel>], iteration_bounds = array<i64: 1>, scalar_prefetch = 0 : i64, scratch_operands = 0 : i64, tpu.core_type = #tpu.core_type<tc>, window_params = [{transform_indices = @transform_0, window_bounds = array<i64: 16, 64>}, {transform_indices = @transform_1, window_bounds = array<i64: 16, 64>}, {pipeline_mode = #tpu.pipeline_mode<synchronous>, transform_indices = @transform_2, window_bounds = array<i64: 64, 512>}, {pipeline_mode = #tpu.pipeline_mode<synchronous>, transform_indices = @transform_3, window_bounds = array<i64: 64, 512>}, {pipeline_mode = #tpu.pipeline_mode<synchronous>, transform_indices = @transform_4, window_bounds = array<i64: 1, 512>}, {pipeline_mode = #tpu.pipeline_mode<synchronous>, transform_indices = @transform_5, window_bounds = array<i64: 128, 128>}, {pipeline_mode = #tpu.pipeline_mode<synchronous>, transform_indices = @transform_6, window_bounds = array<i64: 128, 128>}, {pipeline_mode = #tpu.pipeline_mode<synchronous>, transform_indices = @transform_7, window_bounds = array<i64: 1, 128>}, {transform_indices = @transform_8, window_bounds = array<i64: 16, 128>}]} {
    %c0 = arith.constant 0 : index
    %c0_0 = arith.constant 0 : index
    %0 = vector.load %arg1[%c0, %c0_0] : memref<16x64xbf16, #tpu.memory_space<vmem>>, vector<16x64xbf16>
    %c0_1 = arith.constant 0 : index
    %c0_2 = arith.constant 0 : index
    %1 = vector.load %arg3[%c0_1, %c0_2] : memref<64x512xbf16, #tpu.memory_space<vmem>>, vector<64x512xbf16>
    %cst = arith.constant dense<0.000000e+00> : vector<16x512xf32>
    %2 = tpu.matmul %0, %1, %cst {dimension_numbers = #tpu.dot_dimension_numbers<[1], [0], [0], [1], [0, 0, 1, 1], [], []>} : vector<16x64xbf16>, vector<64x512xbf16>, vector<16x512xf32> -> vector<16x512xf32>
    %c0_3 = arith.constant 0 : index
    %c0_4 = arith.constant 0 : index
    %3 = vector.load %arg2[%c0_3, %c0_4] : memref<16x64xbf16, #tpu.memory_space<vmem>>, vector<16x64xbf16>
    %c0_5 = arith.constant 0 : index
    %c0_6 = arith.constant 0 : index
    %4 = vector.load %arg4[%c0_5, %c0_6] : memref<64x512xbf16, #tpu.memory_space<vmem>>, vector<64x512xbf16>
    %cst_7 = arith.constant dense<0.000000e+00> : vector<16x512xf32>
    %5 = tpu.matmul %3, %4, %cst_7 {dimension_numbers = #tpu.dot_dimension_numbers<[1], [0], [0], [1], [0, 0, 1, 1], [], []>} : vector<16x64xbf16>, vector<64x512xbf16>, vector<16x512xf32> -> vector<16x512xf32>
    %6 = arith.addf %2, %5 : vector<16x512xf32>
    %c0_8 = arith.constant 0 : index
    %c0_9 = arith.constant 0 : index
    %7 = vector.load %arg5[%c0_8, %c0_9] : memref<1x512xf32, #tpu.memory_space<vmem>>, vector<1x512xf32>
    %8 = vector.broadcast %7 : vector<1x512xf32> to vector<16x512xf32>
    %9 = arith.addf %6, %8 : vector<16x512xf32>
    %10 = vector.extract_strided_slice %9 {offsets = [0, 0], sizes = [16, 128], strides = [1, 1]} : vector<16x512xf32> to vector<16x128xf32>
    %11 = vector.extract_strided_slice %9 {offsets = [0, 128], sizes = [16, 128], strides = [1, 1]} : vector<16x512xf32> to vector<16x128xf32>
    %12 = vector.extract_strided_slice %9 {offsets = [0, 256], sizes = [16, 128], strides = [1, 1]} : vector<16x512xf32> to vector<16x128xf32>
    %13 = vector.extract_strided_slice %9 {offsets = [0, 384], sizes = [16, 128], strides = [1, 1]} : vector<16x512xf32> to vector<16x128xf32>
    %14 = arith.mulf %10, %10 : vector<16x128xf32>
    %15 = arith.mulf %11, %11 : vector<16x128xf32>
    %16 = arith.addf %14, %15 : vector<16x128xf32>
    %cst_10 = arith.constant 9.99999993E-9 : f32
    %17 = vector.broadcast %cst_10 : f32 to vector<16x128xf32>
    %18 = arith.addf %16, %17 : vector<16x128xf32>
    %19 = math.sqrt %18 : vector<16x128xf32>
    %cst_11 = arith.constant 0.000000e+00 : f32
    %20 = vector.broadcast %cst_11 : f32 to vector<16x128xf32>
    %21 = arith.subf %20, %19 : vector<16x128xf32>
    %22 = math.exp %21 : vector<16x128xf32>
    %cst_12 = arith.constant 1.000000e+00 : f32
    %23 = vector.broadcast %cst_12 : f32 to vector<16x128xf32>
    %24 = arith.addf %23, %22 : vector<16x128xf32>
    %25 = tpu.reciprocal %24 {approx = true} : vector<16x128xf32> -> vector<16x128xf32>
    %26 = arith.mulf %19, %25 : vector<16x128xf32>
    %27 = arith.mulf %26, %12 : vector<16x128xf32>
    %28 = arith.truncf %27 : vector<16x128xf32> to vector<16x128xbf16>
    %29 = arith.mulf %26, %13 : vector<16x128xf32>
    %30 = arith.truncf %29 : vector<16x128xf32> to vector<16x128xbf16>
    %c0_13 = arith.constant 0 : index
    %c0_14 = arith.constant 0 : index
    %31 = vector.load %arg6[%c0_13, %c0_14] : memref<128x128xbf16, #tpu.memory_space<vmem>>, vector<128x128xbf16>
    %cst_15 = arith.constant dense<0.000000e+00> : vector<16x128xf32>
    %32 = tpu.matmul %28, %31, %cst_15 {dimension_numbers = #tpu.dot_dimension_numbers<[1], [0], [0], [1], [0, 0, 1, 1], [], []>} : vector<16x128xbf16>, vector<128x128xbf16>, vector<16x128xf32> -> vector<16x128xf32>
    %c0_16 = arith.constant 0 : index
    %c0_17 = arith.constant 0 : index
    %33 = vector.load %arg7[%c0_16, %c0_17] : memref<128x128xbf16, #tpu.memory_space<vmem>>, vector<128x128xbf16>
    %cst_18 = arith.constant dense<0.000000e+00> : vector<16x128xf32>
    %34 = tpu.matmul %30, %33, %cst_18 {dimension_numbers = #tpu.dot_dimension_numbers<[1], [0], [0], [1], [0, 0, 1, 1], [], []>} : vector<16x128xbf16>, vector<128x128xbf16>, vector<16x128xf32> -> vector<16x128xf32>
    %35 = arith.addf %32, %34 : vector<16x128xf32>
    %c0_19 = arith.constant 0 : index
    %c0_20 = arith.constant 0 : index
    %36 = vector.load %arg8[%c0_19, %c0_20] : memref<1x128xf32, #tpu.memory_space<vmem>>, vector<1x128xf32>
    %37 = vector.broadcast %36 : vector<1x128xf32> to vector<16x128xf32>
    %38 = arith.addf %35, %37 : vector<16x128xf32>
    %c0_21 = arith.constant 0 : index
    %c0_22 = arith.constant 0 : index
    %39 = vector.load %arg9[%c0_21, %c0_22] : memref<16x128xf32, #tpu.memory_space<vmem>>, vector<16x128xf32>
    tpu.vector_store %arg9[%c0_21, %c0_22], %38 {strides = array<i32>} : memref<16x128xf32, #tpu.memory_space<vmem>>, vector<16x128xf32>,
    return
  }
  func.func @transform_0(%arg0: i32) -> (i32, i32) {
    %c0_i32 = arith.constant 0 : i32
    %c0_i32_0 = arith.constant 0 : i32
    return %arg0, %c0_i32 : i32, i32
  }
  func.func @transform_1(%arg0: i32) -> (i32, i32) {
    %c0_i32 = arith.constant 0 : i32
    %c0_i32_0 = arith.constant 0 : i32
    return %arg0, %c0_i32 : i32, i32
  }
  func.func @transform_2(%arg0: i32) -> (i32, i32) {
    %c0_i32 = arith.constant 0 : i32
    %c0_i32_0 = arith.constant 0 : i32
    %c0_i32_1 = arith.constant 0 : i32
    return %c0_i32, %c0_i32_0 : i32, i32
  }
  func.func @transform_3(%arg0: i32) -> (i32, i32) {
    %c0_i32 = arith.constant 0 : i32
    %c0_i32_0 = arith.constant 0 : i32
    %c0_i32_1 = arith.constant 0 : i32
    return %c0_i32, %c0_i32_0 : i32, i32
  }
  func.func @transform_4(%arg0: i32) -> (i32, i32) {
    %c0_i32 = arith.constant 0 : i32
    %c0_i32_0 = arith.constant 0 : i32
    %c0_i32_1 = arith.constant 0 : i32
    return %c0_i32, %c0_i32_0 : i32, i32
  }
  func.func @transform_5(%arg0: i32) -> (i32, i32) {
    %c0_i32 = arith.constant 0 : i32
    %c0_i32_0 = arith.constant 0 : i32
    %c0_i32_1 = arith.constant 0 : i32
    return %c0_i32, %c0_i32_0 : i32, i32
  }
  func.func @transform_6(%arg0: i32) -> (i32, i32) {
    %c0_i32 = arith.constant 0 : i32
    %c0_i32_0 = arith.constant 0 : i32
    %c0_i32_1 = arith.constant 0 : i32
    return %c0_i32, %c0_i32_0 : i32, i32
  }
  func.func @transform_7(%arg0: i32) -> (i32, i32) {
    %c0_i32 = arith.constant 0 : i32
    %c0_i32_0 = arith.constant 0 : i32
    %c0_i32_1 = arith.constant 0 : i32
    return %c0_i32, %c0_i32_0 : i32, i32
  }
  func.func @transform_8(%arg0: i32) -> (i32, i32) {
    %c0_i32 = arith.constant 0 : i32
    %c0_i32_0 = arith.constant 0 : i32
    return %arg0, %c0_i32 : i32, i32
  }
}

module attributes {stable_mosaic.version = 11 : i64} {
  func.func @qc_swiglu_kernel(%arg0: i32, %arg1: memref<16x64xbf16, #tpu.memory_space<vmem>>, %arg2: memref<16x64xbf16, #tpu.memory_space<vmem>>, %arg3: memref<64x512xbf16, #tpu.memory_space<vmem>>, %arg4: memref<64x512xbf16, #tpu.memory_space<vmem>>, %arg5: memref<1x512xf32, #tpu.memory_space<vmem>>, %arg6: memref<128x128xbf16, #tpu.memory_space<vmem>>, %arg7: memref<128x128xbf16, #tpu.memory_space<vmem>>, %arg8: memref<1x128xf32, #tpu.memory_space<vmem>>, %arg9: memref<16x128xf32, #tpu.memory_space<vmem>>) attributes {dimension_semantics = [#tpu.dimension_semantics<parallel>], iteration_bounds = array<i64: 1>, scalar_prefetch = 0 : i64, scratch_operands = 0 : i64, tpu.core_type = #tpu.core_type<tc>, window_params = [{transform_indices = @transform_0, window_bounds = array<i64: 16, 64>}, {transform_indices = @transform_1, window_bounds = array<i64: 16, 64>}, {pipeline_mode = #tpu.pipeline_mode<synchronous>, transform_indices = @transform_2, window_bounds = array<i64: 64, 512>}, {pipeline_mode = #tpu.pipeline_mode<synchronous>, transform_indices = @transform_3, window_bounds = array<i64: 64, 512>}, {pipeline_mode = #tpu.pipeline_mode<synchronous>, transform_indices = @transform_4, window_bounds = array<i64: 1, 512>}, {pipeline_mode = #tpu.pipeline_mode<synchronous>, transform_indices = @transform_5, window_bounds = array<i64: 128, 128>}, {pipeline_mode = #tpu.pipeline_mode<synchronous>, transform_indices = @transform_6, window_bounds = array<i64: 128, 128>}, {pipeline_mode = #tpu.pipeline_mode<synchronous>, transform_indices = @transform_7, window_bounds = array<i64: 1, 128>}, {transform_indices = @transform_8, window_bounds = array<i64: 16, 128>}]} {
    %c0 = arith.constant 0 : index
    %c0_0 = arith.constant 0 : index
    %0 = vector.load %arg1[%c0, %c0_0] : memref<16x64xbf16, #tpu.memory_space<vmem>>, vector<16x64xbf16>
    %c0_1 = arith.constant 0 : index
    %c0_2 = arith.constant 0 : index
    %1 = vector.load %arg3[%c0_1, %c0_2] : memref<64x512xbf16, #tpu.memory_space<vmem>>, vector<64x512xbf16>
    %cst = arith.constant dense<0.000000e+00> : vector<16x512xf32>
    %2 = tpu.matmul %0, %1, %cst {dimension_numbers = #tpu.dot_dimension_numbers<[1], [0], [0], [1], [0, 0, 1, 1], [], []>} : vector<16x64xbf16>, vector<64x512xbf16>, vector<16x512xf32> -> vector<16x512xf32>
    %c0_3 = arith.constant 0 : index
    %c0_4 = arith.constant 0 : index
    %3 = vector.load %arg2[%c0_3, %c0_4] : memref<16x64xbf16, #tpu.memory_space<vmem>>, vector<16x64xbf16>
    %c0_5 = arith.constant 0 : index
    %c0_6 = arith.constant 0 : index
    %4 = vector.load %arg4[%c0_5, %c0_6] : memref<64x512xbf16, #tpu.memory_space<vmem>>, vector<64x512xbf16>
    %cst_7 = arith.constant dense<0.000000e+00> : vector<16x512xf32>
    %5 = tpu.matmul %3, %4, %cst_7 {dimension_numbers = #tpu.dot_dimension_numbers<[1], [0], [0], [1], [0, 0, 1, 1], [], []>} : vector<16x64xbf16>, vector<64x512xbf16>, vector<16x512xf32> -> vector<16x512xf32>
    %6 = arith.addf %2, %5 : vector<16x512xf32>
    %c0_8 = arith.constant 0 : index
    %c0_9 = arith.constant 0 : index
    %7 = vector.load %arg5[%c0_8, %c0_9] : memref<1x512xf32, #tpu.memory_space<vmem>>, vector<1x512xf32>
    %8 = vector.broadcast %7 : vector<1x512xf32> to vector<16x512xf32>
    %9 = arith.addf %6, %8 : vector<16x512xf32>
    %10 = vector.extract_strided_slice %9 {offsets = [0, 0], sizes = [16, 128], strides = [1, 1]} : vector<16x512xf32> to vector<16x128xf32>
    %11 = vector.extract_strided_slice %9 {offsets = [0, 128], sizes = [16, 128], strides = [1, 1]} : vector<16x512xf32> to vector<16x128xf32>
    %12 = vector.extract_strided_slice %9 {offsets = [0, 256], sizes = [16, 128], strides = [1, 1]} : vector<16x512xf32> to vector<16x128xf32>
    %13 = vector.extract_strided_slice %9 {offsets = [0, 384], sizes = [16, 128], strides = [1, 1]} : vector<16x512xf32> to vector<16x128xf32>
    %14 = arith.mulf %10, %10 : vector<16x128xf32>
    %15 = arith.mulf %11, %11 : vector<16x128xf32>
    %16 = arith.addf %14, %15 : vector<16x128xf32>
    %cst_10 = arith.constant 9.99999993E-9 : f32
    %17 = vector.broadcast %cst_10 : f32 to vector<16x128xf32>
    %18 = arith.addf %16, %17 : vector<16x128xf32>
    %19 = math.sqrt %18 : vector<16x128xf32>
    %cst_11 = arith.constant 0.000000e+00 : f32
    %20 = vector.broadcast %cst_11 : f32 to vector<16x128xf32>
    %21 = arith.subf %20, %19 : vector<16x128xf32>
    %22 = math.exp %21 : vector<16x128xf32>
    %cst_12 = arith.constant 1.000000e+00 : f32
    %23 = vector.broadcast %cst_12 : f32 to vector<16x128xf32>
    %24 = arith.addf %23, %22 : vector<16x128xf32>
    %25 = tpu.reciprocal %24 {approx = true} : vector<16x128xf32> -> vector<16x128xf32>
    %26 = arith.mulf %19, %25 : vector<16x128xf32>
    %27 = arith.mulf %26, %12 : vector<16x128xf32>
    %28 = arith.truncf %27 : vector<16x128xf32> to vector<16x128xbf16>
    %29 = arith.mulf %26, %13 : vector<16x128xf32>
    %30 = arith.truncf %29 : vector<16x128xf32> to vector<16x128xbf16>
    %c0_13 = arith.constant 0 : index
    %c0_14 = arith.constant 0 : index
    %31 = vector.load %arg6[%c0_13, %c0_14] : memref<128x128xbf16, #tpu.memory_space<vmem>>, vector<128x128xbf16>
    %cst_15 = arith.constant dense<0.000000e+00> : vector<16x128xf32>
    %32 = tpu.matmul %28, %31, %cst_15 {dimension_numbers = #tpu.dot_dimension_numbers<[1], [0], [0], [1], [0, 0, 1, 1], [], []>} : vector<16x128xbf16>, vector<128x128xbf16>, vector<16x128xf32> -> vector<16x128xf32>
    %c0_16 = arith.constant 0 : index
    %c0_17 = arith.constant 0 : index
    %33 = vector.load %arg7[%c0_16, %c0_17] : memref<128x128xbf16, #tpu.memory_space<vmem>>, vector<128x128xbf16>
    %cst_18 = arith.constant dense<0.000000e+00> : vector<16x128xf32>
    %34 = tpu.matmul %30, %33, %cst_18 {dimension_numbers = #tpu.dot_dimension_numbers<[1], [0], [0], [1], [0, 0, 1, 1], [], []>} : vector<16x128xbf16>, vector<128x128xbf16>, vector<16x128xf32> -> vector<16x128xf32>
    %35 = arith.addf %32, %34 : vector<16x128xf32>
    %c0_19 = arith.constant 0 : index
    %c0_20 = arith.constant 0 : index
    %36 = vector.load %arg8[%c0_19, %c0_20] : memref<1x128xf32, #tpu.memory_space<vmem>>, vector<1x128xf32>
    %37 = vector.broadcast %36 : vector<1x128xf32> to vector<16x128xf32>
    %38 = arith.addf %35, %37 : vector<16x128xf32>
    %c0_21 = arith.constant 0 : index
    %c0_22 = arith.constant 0 : index
    %39 = vector.load %arg9[%c0_21, %c0_22] : memref<16x128xf32, #tpu.memory_space<vmem>>, vector<16x128xf32>
    tpu.vector_store %arg9[%c0_21, %c0_22], %38 {strides = array<i32>} : memref<16x128xf32, #tpu.memory_space<vmem>>, vector<16x128xf32>,
    return
  }
  func.func @transform_0(%arg0: i32) -> (i32, i32) {
    %c0_i32 = arith.constant 0 : i32
    %c0_i32_0 = arith.constant 0 : i32
    return %arg0, %c0_i32 : i32, i32
  }
  func.func @transform_1(%arg0: i32) -> (i32, i32) {
    %c0_i32 = arith.constant 0 : i32
    %c0_i32_0 = arith.constant 0 : i32
    return %arg0, %c0_i32 : i32, i32
  }
  func.func @transform_2(%arg0: i32) -> (i32, i32) {
    %c0_i32 = arith.constant 0 : i32
    %c0_i32_0 = arith.constant 0 : i32
    %c0_i32_1 = arith.constant 0 : i32
    return %c0_i32, %c0_i32_0 : i32, i32
  }
  func.func @transform_3(%arg0: i32) -> (i32, i32) {
    %c0_i32 = arith.constant 0 : i32
    %c0_i32_0 = arith.constant 0 : i32
    %c0_i32_1 = arith.constant 0 : i32
    return %c0_i32, %c0_i32_0 : i32, i32
  }
  func.func @transform_4(%arg0: i32) -> (i32, i32) {
    %c0_i32 = arith.constant 0 : i32
    %c0_i32_0 = arith.constant 0 : i32
    %c0_i32_1 = arith.constant 0 : i32
    return %c0_i32, %c0_i32_0 : i32, i32
  }
  func.func @transform_5(%arg0: i32) -> (i32, i32) {
    %c0_i32 = arith.constant 0 : i32
    %c0_i32_0 = arith.constant 0 : i32
    %c0_i32_1 = arith.constant 0 : i32
    return %c0_i32, %c0_i32_0 : i32, i32
  }
  func.func @transform_6(%arg0: i32) -> (i32, i32) {
    %c0_i32 = arith.constant 0 : i32
    %c0_i32_0 = arith.constant 0 : i32
    %c0_i32_1 = arith.constant 0 : i32
    return %c0_i32, %c0_i32_0 : i32, i32
  }
  func.func @transform_7(%arg0: i32) -> (i32, i32) {
    %c0_i32 = arith.constant 0 : i32
    %c0_i32_0 = arith.constant 0 : i32
    %c0_i32_1 = arith.constant 0 : i32
    return %c0_i32, %c0_i32_0 : i32, i32
  }
  func.func @transform_8(%arg0: i32) -> (i32, i32) {
    %c0_i32 = arith.constant 0 : i32
    %c0_i32_0 = arith.constant 0 : i32
    return %arg0, %c0_i32 : i32, i32
  }
}

</mosaic_0001>

<bundles_post_ra>
// kernel: tpu_custom_call.1
= control target key start
LH: loop header
LB: loop body
LE: loop exit
PB: predicated region body
PF: predicated region fallthrough
CT: control target
= control target key end

     0   :  { %13 = vsyncpa [#allocation3], 0  ;;  %s1365_s0 = inlined_call_operand.hbm [shape: bf16[16,64], index: 0, kind: input, shape index: {}]   ;;  %s1366_s1 = inlined_call_operand.hbm [shape: bf16[16,64], index: 1, kind: input, shape index: {}]   ;;  %s1367_s2 = inlined_call_operand.hbm [shape: bf16[64,512], index: 2, kind: input, shape index: {}]   ;;  %s1368_s3 = inlined_call_operand.hbm [shape: bf16[64,512], index: 3, kind: input, shape index: {}]   ;;  %s1369_s4 = inlined_call_operand.vmem [shape: f32[1,512], index: 4, kind: input, shape index: {}]   ;;  %s1370_s5 = inlined_call_operand.hbm [shape: bf16[128,128], index: 5, kind: input, shape index: {}]   ;;  %s1371_s6 = inlined_call_operand.hbm [shape: bf16[128,128], index: 6, kind: input, shape index: {}]   ;;  %s1372_s7 = inlined_call_operand.vmem [shape: f32[1,128], index: 7, kind: input, shape index: {}]   ;;  %s1373_s8 = inlined_call_operand.hbm [shape: f32[16,128], index: 8, kind: output, shape index: {}]  }
   0x1   :  { %14 = vsyncpa [#allocation6], 0 }
   0x2   :  { %15 = vsyncpa [#allocation9], 0 }
   0x3   :  { %16 = vsyncpa [#allocation12], 0 }
   0x4   :  { %17 = vsyncpa [#allocation4], 0  ;;  %s1188_s27 = smov [#allocation5]   ;;  %s1024_s9 = scalar_lea.hbm %s1366_s1, 128 }
   0x5   :  { %s35_s28 = sshll.u32 %s1188_s27, 4  ;;  %p1025_p0 = scmp.ne.s32.totalorder %s1366_s1, %s1024_s9  ;;  %s36_s28 = int_to_ptr.vmem [resolvable:$true] %s35_s28 }
   0x6   :  { %p1028_p1 = scmp.lt.u32.totalorder %s1024_s9, %s1366_s1 }
   0x8   :  { %p1030_p2 = pnand %p1028_p1, %p1025_p0 }
   0xa   :  { %1033 = shalt.err (!%p1030_p2)
}
   0xb   :  { %s1034_s14 = scalar_lea.vmem %s36_s28, 128  ;;  %p1039_p4 = scmp.lt.s32.totalorder %s36_s28, %s36_s28 }
   0xc   :  { %p1035_p3 = scmp.ne.s32.totalorder %s36_s28, %s1034_s14  ;;  %p1040_p5 = scmp.lt.s32.totalorder %s1034_s14, %s1034_s14 }
   0xe   :  { %p1041_p6 = por %p1040_p5, %p1039_p4 }
  0x10   :  { %p1042_p7 = pnand %p1041_p6, %p1035_p3 }
  0x12   :  { %1045 = shalt.err (!%p1042_p7)
}
  0x13   :  { %s1189_s15 = smov 64   ;;  %s1190_s16 = smov 4  }
  0x14   :  { %41 = dma.hbm_to_vmem [thread:$0]  %s1366_s1, 128, %s36_s28, [#allocation6], %s1189_s15, %s1189_s15, %s1190_s16  }
  0x15   :  { %s1191_s19 = smov [#allocation8]   ;;  %s1192_s21 = smov [#allocation2]  }
  0x16   :  { %s59_s20 = sshll.u32 %s1191_s19, 4  ;;  %s23_s22 = sshll.u32 %s1192_s21, 4  ;;  %s60_s20 = int_to_ptr.vmem [resolvable:$true] %s59_s20  ;;  %s24_s22 = int_to_ptr.vmem [resolvable:$true] %s23_s22 }
  0x17   :  { %s1046_s25 = scalar_lea.hbm %s1368_s3, 2048 }
  0x18   :  { %p1047_p8 = scmp.ne.s32.totalorder %s1368_s3, %s1046_s25  ;;  %p1050_p9 = scmp.lt.u32.totalorder %s1046_s25, %s1368_s3 }
  0x1a   :  { %p1052_p10 = pnand %p1050_p9, %p1047_p8 }
  0x1c   :  { %1055 = shalt.err (!%p1052_p10)
}
  0x1d   :  { %s1056_s1 = scalar_lea.vmem %s60_s20, 2048  ;;  %p1061_p12 = scmp.lt.s32.totalorder %s60_s20, %s60_s20 }
  0x1e   :  { %p1057_p11 = scmp.ne.s32.totalorder %s60_s20, %s1056_s1  ;;  %p1062_p13 = scmp.lt.s32.totalorder %s1056_s1, %s1056_s1 }
  0x20   :  { %p1063_p0 = por %p1062_p13, %p1061_p12 }
  0x22   :  { %p1064_p1 = pnand %p1063_p0, %p1057_p11 }
  0x24   :  { %1067 = shalt.err (!%p1064_p1)
}
  0x25   :  { %s1193_s28 = smov 256   ;;  %s1194_s9 = smov 16  }
  0x26   :  { %65 = dma.hbm_to_vmem [thread:$0]  %s1368_s3, 2048, %s60_s20, [#allocation9], %s1193_s28, %s1193_s28, %s1194_s9  }
  0x27   :  { %s1068_s14 = scalar_lea.hbm %s1365_s0, 128 }
  0x28   :  { %p1069_p2 = scmp.ne.s32.totalorder %s1365_s0, %s1068_s14  ;;  %p1072_p3 = scmp.lt.u32.totalorder %s1068_s14, %s1365_s0 }
  0x2a   :  { %p1074_p4 = pnand %p1072_p3, %p1069_p2 }
  0x2c   :  { %1077 = shalt.err (!%p1074_p4)
}
  0x2d   :  { %s1078_s23 = scalar_lea.vmem %s24_s22, 128  ;;  %p1083_p6 = scmp.lt.s32.totalorder %s24_s22, %s24_s22 }
  0x2e   :  { %p1079_p5 = scmp.ne.s32.totalorder %s24_s22, %s1078_s23  ;;  %p1084_p7 = scmp.lt.s32.totalorder %s1078_s23, %s1078_s23 }
  0x30   :  { %p1085_p8 = por %p1084_p7, %p1083_p6 }
  0x32   :  { %p1086_p9 = pnand %p1085_p8, %p1079_p5 }
  0x34   :  { %1089 = shalt.err (!%p1086_p9)
}
  0x35   :  { %29 = dma.hbm_to_vmem [thread:$0]  %s1365_s0, 128, %s24_s22, [#allocation3], %s1189_s15, %s1189_s15, %s1190_s16  }
  0x36   :  { %s1195_s24 = smov [#allocation7]   ;;  %s1196_s26 = smov [#allocation10]  }
  0x37   :  { %s47_s25 = sshll.u32 %s1195_s24, 4  ;;  %s73_s27 = sshll.u32 %s1196_s26, 4  ;;  %s48_s25 = int_to_ptr.vmem [resolvable:$true] %s47_s25  ;;  %s74_s27 = int_to_ptr.vmem [resolvable:$true] %s73_s27 }
  0x38   :  { %s1090_s1 = scalar_lea.hbm %s1367_s2, 2048 }
  0x39   :  { %p1091_p10 = scmp.ne.s32.totalorder %s1367_s2, %s1090_s1  ;;  %p1094_p11 = scmp.lt.u32.totalorder %s1090_s1, %s1367_s2 }
  0x3b   :  { %p1096_p12 = pnand %p1094_p11, %p1091_p10 }
  0x3d   :  { %1099 = shalt.err (!%p1096_p12)
}
  0x3e   :  { %s1100_s0 = scalar_lea.vmem %s48_s25, 2048  ;;  %p1105_p0 = scmp.lt.s32.totalorder %s48_s25, %s48_s25 }
  0x3f   :  { %p1101_p13 = scmp.ne.s32.totalorder %s48_s25, %s1100_s0  ;;  %p1106_p1 = scmp.lt.s32.totalorder %s1100_s0, %s1100_s0 }
  0x41   :  { %p1107_p2 = por %p1106_p1, %p1105_p0 }
  0x43   :  { %p1108_p3 = pnand %p1107_p2, %p1101_p13 }
  0x45   :  { %1111 = shalt.err (!%p1108_p3)
}
  0x46   :  { %53 = dma.hbm_to_vmem [thread:$0]  %s1367_s2, 2048, %s48_s25, [#allocation6], %s1193_s28, %s1193_s28, %s1194_s9  }
  0x47   :  { %s1112_s19 = scalar_lea.hbm %s1370_s5, 1024 }
  0x48   :  { %p1113_p4 = scmp.ne.s32.totalorder %s1370_s5, %s1112_s19  ;;  %p1116_p5 = scmp.lt.u32.totalorder %s1112_s19, %s1370_s5 }
  0x4a   :  { %p1118_p6 = pnand %p1116_p5, %p1113_p4 }
  0x4c   :  { %1121 = shalt.err (!%p1118_p6)
}
  0x4d   :  { %s1122_s24 = scalar_lea.vmem %s74_s27, 1024  ;;  %p1127_p8 = scmp.lt.s32.totalorder %s74_s27, %s74_s27 }
  0x4e   :  { %p1123_p7 = scmp.ne.s32.totalorder %s74_s27, %s1122_s24  ;;  %p1128_p9 = scmp.lt.s32.totalorder %s1122_s24, %s1122_s24 }
  0x50   :  { %p1129_p10 = por %p1128_p9, %p1127_p8 }
  0x52   :  { %p1130_p11 = pnand %p1129_p10, %p1123_p7 }
  0x54   :  { %1133 = shalt.err (!%p1130_p11)
}
  0x55   :  { %79 = dma.hbm_to_vmem [thread:$0]  %s1370_s5, 1024, %s74_s27, [#allocation9], %s1189_s15, %s1189_s15, %s1190_s16  }
  0x56   :  { %s1197_s9 = smov [#allocation11]   ;;  %s1134_s30 = scalar_lea.hbm %s1371_s6, 1024 }
  0x57   :  { %s85_s25 = sshll.u32 %s1197_s9, 4  ;;  %p1135_p12 = scmp.ne.s32.totalorder %s1371_s6, %s1134_s30  ;;  %s86_s25 = int_to_ptr.vmem [resolvable:$true] %s85_s25 }
  0x58   :  { %p1138_p13 = scmp.lt.u32.totalorder %s1134_s30, %s1371_s6 }
  0x5a   :  { %p1140_p0 = pnand %p1138_p13, %p1135_p12 }
  0x5c   :  { %1143 = shalt.err (!%p1140_p0)
}
  0x5d   :  { %s1144_s13 = scalar_lea.vmem %s86_s25, 1024  ;;  %p1149_p2 = scmp.lt.s32.totalorder %s86_s25, %s86_s25 }
  0x5e   :  { %p1145_p1 = scmp.ne.s32.totalorder %s86_s25, %s1144_s13  ;;  %p1150_p3 = scmp.lt.s32.totalorder %s1144_s13, %s1144_s13 }
  0x60   :  { %p1151_p4 = por %p1150_p3, %p1149_p2 }
  0x62   :  { %p1152_p5 = pnand %p1151_p4, %p1145_p1 }
  0x64   :  { %1155 = shalt.err (!%p1152_p5)
}
  0x65   :  { %91 = dma.hbm_to_vmem [thread:$0]  %s1371_s6, 1024, %s86_s25, [#allocation12], %s1189_s15, %s1189_s15, %s1190_s16  }
  0x66   :  { %1178 = dma.done.wait [#allocation3], 128  }
  0x67   :  { %1179 = vsyncadd [#allocation3], 4294967168 }
  0x68   :  { %1180 = dma.done.wait [#allocation6], 2176  }
  0x69   :  { %1181 = vsyncadd [#allocation6], 4294965120 }
  0x6a   :  { %1182 = dma.done.wait [#allocation9], 3072  }
  0x6b   :  { %1183 = vsyncadd [#allocation9], 4294964224 }
  0x6c   :  { %1184 = dma.done.wait [#allocation12], 1024  }
  0x6d   :  { %1185 = vsyncadd [#allocation12], 4294966272  ;;  %v1198_v0 = vmov 0   ;;  %v946_v1 = vld [vmem:[#allocation8 + $0x4] ss:$16 sps:$4 sm:$0xff]   ;;  %v961_v10 = vld [vmem:[#allocation5] sm:$0xff]   ;;  %v500_v52 = vlaneseq }
  0x6e   :  { %270 = vmatprep.mubr.bf16.mxu0 %v1198_v0  ;;  %313 = vmatprep.mubr.bf16.mxu1 %v1198_v0  ;;  %v948_v2 = vld [vmem:[#allocation8] ss:$16 sps:$4 sm:$0xff]   ;;  %v949_v3 = vld [vmem:[#allocation8 + $0x24] ss:$16 sps:$4 sm:$0xff]   ;;  %v972_v11 = vld [vmem:[#allocation8 + $0xc] ss:$16 sps:$4 sm:$0xff]  }
  0x6f   :  { %238 = vmatprep.subr.bf16.mxu0 %v946_v1  ;;  %v951_v4 = vld [vmem:[#allocation8 + $0x20] ss:$16 sps:$4 sm:$0xff]   ;;  %v952_v5 = vld [vmem:[#allocation8 + $0x44] ss:$16 sps:$4 sm:$0xff]   ;;  %v974_v12 = vld [vmem:[#allocation8 + $0x8] ss:$16 sps:$4 sm:$0xff]   ;;  %281 = vmatprep.subr.bf16.mxu1 %v972_v11 }
  0x70   :  { %239 = vmatpush1.bf16.msra.mxu0 %v948_v2  ;;  %v954_v6 = vld [vmem:[#allocation8 + $0x40] ss:$16 sps:$4 sm:$0xff]   ;;  %v955_v7 = vld [vmem:[#allocation8 + $0x64] ss:$16 sps:$4 sm:$0xff]   ;;  %v975_v13 = vld [vmem:[#allocation8 + $0x2c] ss:$16 sps:$4 sm:$0xff]   ;;  %282 = vmatpush1.bf16.msra.mxu1 %v974_v12 }
  0x71   :  { %240 = vmatprep.subr.bf16.mxu0 %v949_v3  ;;  %v957_v8 = vld [vmem:[#allocation8 + $0x60] ss:$16 sps:$4 sm:$0xff]   ;;  %v960_v9 = vld [vmem:[#allocation7 + $0x4] ss:$16 sps:$4 sm:$0xff]   ;;  %vm234_vm0 = vcmask 523264   ;;  %283 = vmatprep.subr.bf16.mxu1 %v975_v13  ;;  %v1199_v37 = vmov 0.0  }
  0x72   :  { %v958_v14 = vld [vmem:[#allocation7] ss:$16 sps:$4 sm:$0xff]   ;;  %v964_v15 = vld [vmem:[#allocation7 + $0x24] ss:$16 sps:$4 sm:$0xff]   ;;  %v977_v16 = vld [vmem:[#allocation8 + $0x28] ss:$16 sps:$4 sm:$0xff]  }
  0x73   :  { %v978_v17 = vld [vmem:[#allocation8 + $0x4c] ss:$16 sps:$4 sm:$0xff]   ;;  %v962_v18 = vld [vmem:[#allocation7 + $0x20] ss:$16 sps:$4 sm:$0xff]   ;;  %v967_v19 = vld [vmem:[#allocation7 + $0x44] ss:$16 sps:$4 sm:$0xff]  }
  0x74   :  { %241 = vmatpush1.bf16.msra.mxu0 %v951_v4  ;;  %284 = vmatpush1.bf16.msra.mxu1 %v977_v16  ;;  %v980_v20 = vld [vmem:[#allocation8 + $0x48] ss:$16 sps:$4 sm:$0xff]   ;;  %v965_v21 = vld [vmem:[#allocation7 + $0x40] ss:$16 sps:$4 sm:$0xff]   ;;  %v981_v22 = vld [vmem:[#allocation8 + $0x6c] ss:$16 sps:$4 sm:$0xff]  }
  0x75   :  { %242 = vmatprep.subr.bf16.mxu0 %v952_v5  ;;  %285 = vmatprep.subr.bf16.mxu1 %v978_v17  ;;  %v970_v23 = vld [vmem:[#allocation7 + $0x64] ss:$16 sps:$4 sm:$0xff]   ;;  %v983_v24 = vld [vmem:[#allocation8 + $0x68] ss:$16 sps:$4 sm:$0xff]   ;;  %v986_v25 = vld [vmem:[#allocation7 + $0xc] ss:$16 sps:$4 sm:$0xff]  }
  0x76   :  { %v968_v26 = vld [vmem:[#allocation7 + $0x60] ss:$16 sps:$4 sm:$0xff]   ;;  %v984_v27 = vld [vmem:[#allocation7 + $0x8] ss:$16 sps:$4 sm:$0xff]   ;;  %v989_v28 = vld [vmem:[#allocation7 + $0x2c] ss:$16 sps:$4 sm:$0xff]  }
  0x77   :  { %v971_v29 = vld [vmem:[#allocation2] sm:$0xff]   ;;  %v987_v30 = vld [vmem:[#allocation7 + $0x28] ss:$16 sps:$4 sm:$0xff]   ;;  %v992_v31 = vld [vmem:[#allocation7 + $0x4c] ss:$16 sps:$4 sm:$0xff]   ;;  %vm1200_vm1 = vmmov 0  }
  0x78   :  { %243 = vmatpush1.bf16.msra.mxu0 %v954_v6  ;;  %286 = vmatpush1.bf16.msra.mxu1 %v980_v20  ;;  %v990_v32 = vld [vmem:[#allocation7 + $0x48] ss:$16 sps:$4 sm:$0xff]   ;;  %v995_v33 = vld [vmem:[#allocation7 + $0x6c] ss:$16 sps:$4 sm:$0xff]   ;;  %v996_v35 = vld [vmem:[#allocation11] sm:$0xff]   ;;  %v501_v53 = vshrl.u32 %v500_v52, 7 }
  0x79   :  { %244 = vmatprep.subr.bf16.mxu0 %v955_v7  ;;  %287 = vmatprep.subr.bf16.mxu1 %v981_v22  ;;  %v993_v34 = vld [vmem:[#allocation7 + $0x68] ss:$16 sps:$4 sm:$0xff]   ;;  %v997_v36 = vld [vmem:[#allocation10] sm:$0xff]   ;;  %v1000_v40 = vld [vmem:[#allocation11 + $0x10] sm:$0xff]   ;;  %s1201_s0 = smov [#allocation13]  }
  0x7a   :  { %v998_v38 = vld [vmem:[#allocation11 + $0x8] sm:$0xff]   ;;  %v1001_v41 = vld [vmem:[#allocation10 + $0x10] sm:$0xff]   ;;  %v1002_v42 = vld [vmem:[#allocation11 + $0x18] sm:$0xff]   ;;  %v502_v54 = vsub.s32 0, %v501_v53  ;;  %v506_v56 = vsub.s32 1, %v501_v53  ;;  %s794_s22 = sshll.u32 %s1201_s0, 4  ;;  %s795_s22 = int_to_ptr.vmem [resolvable:$true] %s794_s22 }
  0x7b   :  { %v999_v39 = vld [vmem:[#allocation10 + $0x8] sm:$0xff]   ;;  %v1003_v43 = vld [vmem:[#allocation10 + $0x18] sm:$0xff]   ;;  %v1004_v44 = vld [vmem:[#allocation11 + $0x20] sm:$0xff]   ;;  %s1156_s14 = scalar_lea.vmem %s795_s22, 256  ;;  %p1161_p7 = scmp.lt.s32.totalorder %s795_s22, %s795_s22 }
  0x7c   :  { %245 = vmatpush1.bf16.msra.mxu0 %v957_v8  ;;  %288 = vmatpush1.bf16.msra.mxu1 %v983_v24  ;;  %v1005_v45 = vld [vmem:[#allocation10 + $0x20] sm:$0xff]   ;;  %v1006_v46 = vld [vmem:[#allocation11 + $0x28] sm:$0xff]   ;;  %v1008_v48 = vld [vmem:[#allocation11 + $0x30] sm:$0xff]   ;;  %p1157_p6 = scmp.ne.s32.totalorder %s795_s22, %s1156_s14  ;;  %p1162_p8 = scmp.lt.s32.totalorder %s1156_s14, %s1156_s14 }
  0x7d   :  { %412 = vmatprep.subr.bf16.mxu0 %v960_v9  ;;  %455 = vmatprep.subr.bf16.mxu1 %v986_v25  ;;  %v1007_v47 = vld [vmem:[#allocation10 + $0x28] sm:$0xff]   ;;  %v1009_v49 = vld [vmem:[#allocation10 + $0x30] sm:$0xff]   ;;  %v1010_v50 = vld [vmem:[#allocation11 + $0x38] sm:$0xff]  }
  0x7e   :  { %v1011_v51 = vld [vmem:[#allocation10 + $0x38] sm:$0xff]   ;;  %v498_v55 = vld [vmem:[%s1369_s4] sm:$0xf]  ;;  %p1163_p9 = por %p1162_p8, %p1161_p7 }
  0x7f   :  { %826 = vmatmul.mubr.msk.bf16.vlgmr.msra.gmra.mrb[0].mxu0 %vm234_vm0, %v961_v10  ;;  %827 = vmatmul.mubr.msk.bf16.vlgmr.msra.gmra.mrb[0].mxu1 %vm234_vm0, %v961_v10  ;;  %v503_v57 = vrot.slane %v498_v55, %v502_v54  ;;  %v507_v58 = vrot.slane %v498_v55, %v506_v56 }
  0x80   :  { %413 = vmatpush1.bf16.msra.mxu0 %v958_v14  ;;  %444 = vmatprep.mubr.bf16.mxu0 %v1198_v0  ;;  %p1164_p10 = pnand %p1163_p9, %p1157_p6 }
  0x81   :  { %414 = vmatprep.subr.bf16.mxu0 %v964_v15  ;;  %456 = vmatpush1.bf16.msra.mxu1 %v984_v27 }
  0x82   :  { %487 = vmatprep.mubr.bf16.mxu1 %v1198_v0  ;;  %457 = vmatprep.subr.bf16.mxu1 %v989_v28 }
  0x84   :  { %415 = vmatpush1.bf16.msra.mxu0 %v962_v18 }
  0x85   :  { %416 = vmatprep.subr.bf16.mxu0 %v967_v19  ;;  %458 = vmatpush1.bf16.msra.mxu1 %v987_v30 }
  0x86   :  { %459 = vmatprep.subr.bf16.mxu1 %v992_v31 }
  0x88   :  { %417 = vmatpush1.bf16.msra.mxu0 %v965_v21 }
  0x89   :  { %418 = vmatprep.subr.bf16.mxu0 %v970_v23  ;;  %460 = vmatpush1.bf16.msra.mxu1 %v990_v32 }
  0x8a   :  { %461 = vmatprep.subr.bf16.mxu1 %v995_v33  ;;  %v510_v33 = vsub.s32 2, %v501_v53 }
  0x8c   :  { %419 = vmatpush1.bf16.msra.mxu0 %v968_v26 }
  0x8d   :  { %462 = vmatpush1.bf16.msra.mxu1 %v993_v34  ;;  %882 = vmatprep.subr.bf16.mxu0 %v1199_v37  ;;  %v514_v34 = vsub.s32 3, %v501_v53  ;;  %v863_v53 = vld [vmem:[%s1372_s7] ss:$0 sm:$0xff] }
  0x8e   :  { %902 = vmatprep.subr.bf16.mxu1 %v1199_v37 }
  0x8f   :  { %845 = vmatmul.mubr.msk.bf16.vlgmr.msra.gmra.mrb[0].mxu0 %vm234_vm0, %v971_v29 }
  0x90   :  { %846 = vmatmul.mubr.msk.bf16.vlgmr.msra.gmra.mrb[0].mxu1 %vm234_vm0, %v971_v29  ;;  %883 = vmatpush3.bf16.msra.mxu0 %v996_v35  ;;  %v511_v35 = vrot.slane %v498_v55, %v510_v33 }
  0x91   :  { %903 = vmatpush3.bf16.msra.mxu1 %v997_v36  ;;  %884 = vmatprep.subr.bf16.mxu0 %v1199_v37  ;;  %v515_v36 = vrot.slane %v498_v55, %v514_v34 }
  0x92   :  { %904 = vmatprep.subr.bf16.mxu1 %v1199_v37  ;;  %898 = vmatprep.mubr.msk.bf16.mxu0 %vm1200_vm1, %v1199_v37 }
  0x93   :  { %918 = vmatprep.mubr.msk.bf16.mxu1 %vm1200_vm1, %v1199_v37 }
  0x94   :  { %885 = vmatpush3.bf16.msra.mxu0 %v998_v38 }
  0x95   :  { %905 = vmatpush3.bf16.msra.mxu1 %v999_v39  ;;  %886 = vmatprep.subr.bf16.mxu0 %v1199_v37 }
  0x96   :  { %906 = vmatprep.subr.bf16.mxu1 %v1199_v37 }
  0x98   :  { %887 = vmatpush3.bf16.msra.mxu0 %v1000_v40 }
  0x99   :  { %907 = vmatpush3.bf16.msra.mxu1 %v1001_v41  ;;  %888 = vmatprep.subr.bf16.mxu0 %v1199_v37 }
  0x9a   :  { %908 = vmatprep.subr.bf16.mxu1 %v1199_v37 }
  0x9c   :  { %889 = vmatpush3.bf16.msra.mxu0 %v1002_v42 }
  0x9d   :  { %909 = vmatpush3.bf16.msra.mxu1 %v1003_v43  ;;  %890 = vmatprep.subr.bf16.mxu0 %v1199_v37 }
  0x9e   :  { %910 = vmatprep.subr.bf16.mxu1 %v1199_v37 }
  0xa0   :  { %891 = vmatpush3.bf16.msra.mxu0 %v1004_v44 }
  0xa1   :  { %911 = vmatpush3.bf16.msra.mxu1 %v1005_v45  ;;  %892 = vmatprep.subr.bf16.mxu0 %v1199_v37 }
  0xa2   :  { %912 = vmatprep.subr.bf16.mxu1 %v1199_v37 }
  0xa4   :  { %893 = vmatpush3.bf16.msra.mxu0 %v1006_v46 }
  0xa5   :  { %913 = vmatpush3.bf16.msra.mxu1 %v1007_v47  ;;  %894 = vmatprep.subr.bf16.mxu0 %v1199_v37 }
  0xa6   :  { %914 = vmatprep.subr.bf16.mxu1 %v1199_v37 }
  0xa8   :  { %895 = vmatpush3.bf16.msra.mxu0 %v1008_v48 }
  0xa9   :  { %915 = vmatpush3.bf16.msra.mxu1 %v1009_v49  ;;  %896 = vmatprep.subr.bf16.mxu0 %v1199_v37 }
  0xaa   :  { %916 = vmatprep.subr.bf16.mxu1 %v1199_v37 }
  0xac   :  { %897 = vmatpush3.bf16.msra.mxu0 %v1010_v50 }
  0xad   :  { %917 = vmatpush3.bf16.msra.mxu1 %v1011_v51 }
 0x162   :  { %v446_v59 = vpop.f32.mrb[0].mxu0 }
 0x163   :  { %v520_v60 = vadd.f32 %v503_v57, %v446_v59  ;;  %v448_v61 = vpop.f32.mrb[1].mxu0  ;;  %v489_v11 = vpop.f32.mrb[0].mxu1 }
 0x164   :  { %v521_v62 = vadd.f32 %v507_v58, %v448_v61  ;;  %v450_v63 = vpop.f32.mrb[2].mxu0  ;;  %v491_v12 = vpop.f32.mrb[1].mxu1  ;;  %v522_v38 = vadd.f32 %v511_v35, %v489_v11 }
 0x165   :  { %v528_v0 = vmul.f32 %v520_v60, %v520_v60  ;;  %v524_v1 = vadd.f32 %v503_v57, %v450_v63  ;;  %v452_v2 = vpop.f32.mrb[3].mxu0  ;;  %v493_v13 = vpop.f32.mrb[2].mxu1  ;;  %v523_v40 = vadd.f32 %v515_v36, %v491_v12 }
 0x166   :  { %v530_v3 = vmul.f32 %v521_v62, %v521_v62  ;;  %v525_v4 = vadd.f32 %v507_v58, %v452_v2  ;;  %v495_v14 = vpop.f32.mrb[3].mxu1  ;;  %v526_v42 = vadd.f32 %v511_v35, %v493_v13 }
 0x167   :  { %v529_v5 = vmul.f32 %v524_v1, %v524_v1  ;;  %v527_v46 = vadd.f32 %v515_v36, %v495_v14 }
 0x168   :  { %v532_v6 = vadd.f32 %v530_v3, %v528_v0  ;;  %v531_v7 = vmul.f32 %v525_v4, %v525_v4 }
 0x16a   :  { %v534_v8 = vadd.f32 1e-08, %v532_v6  ;;  %v533_v9 = vadd.f32 %v531_v7, %v529_v5 }
 0x16c   :  { %1012 = vrsqrt.f32 %v534_v8  ;;  %v535_v10 = vadd.f32 1e-08, %v533_v9  ;;  %vm538_vm2 = vcmp.eq.f32.partialorder %v534_v8, inf  ;;  %v541_v18 = vand.u32 2147483648, %v534_v8 }
 0x16d   :  { %vm540_vm3 = vcmp.eq.f32.partialorder %v534_v8, 0.0 }
 0x16e   :  { %1014 = vrsqrt.f32 %v535_v10  ;;  %vm545_vm4 = vcmp.eq.f32.partialorder %v535_v10, inf  ;;  %v548_v22 = vand.u32 2147483648, %v535_v10  ;;  %vm547_vm5 = vcmp.eq.f32.partialorder %v535_v10, 0.0 }
 0x176   :  { %v1013_v15 = vpop.eup %1012 }
 0x177   :  { %v537_v16 = vmul.f32 %v1013_v15, %v534_v8 }
 0x178   :  { %v1015_v17 = vpop.eup %1014 }
 0x179   :  { %v539_v19 = vsel %vm538_vm2, %v534_v8, %v537_v16  ;;  %v544_v20 = vmul.f32 %v1015_v17, %v535_v10 }
 0x17a   :  { %v542_v21 = vsel %vm540_vm3, %v541_v18, %v539_v19 }
 0x17b   :  { %v550_v23 = vsub.f32 0.0, %v542_v21  ;;  %v546_v24 = vsel %vm545_vm4, %v535_v10, %v544_v20 }
 0x17c   :  { %v549_v25 = vsel %vm547_vm5, %v548_v22, %v546_v24 }
 0x17d   :  { %v552_v26 = vmul.f32 1.442695, %v550_v23  ;;  %v551_v27 = vsub.f32 0.0, %v549_v25 }
 0x17f   :  { %1016 = vpow2.f32 %v552_v26  ;;  %v554_v28 = vmul.f32 1.442695, %v551_v27 }
 0x181   :  { %1018 = vpow2.f32 %v554_v28 }
 0x189   :  { %v1017_v29 = vpop.eup %1016 }
 0x18a   :  { %v556_v30 = vadd.f32 1.0, %v1017_v29 }
 0x18b   :  { %v1019_v31 = vpop.eup %1018 }
 0x18c   :  { %1020 = vrcp.f32 %v556_v30  ;;  %v557_v32 = vadd.f32 1.0, %v1019_v31 }
 0x18e   :  { %1022 = vrcp.f32 %v557_v32 }
 0x196   :  { %v1021_v37 = vpop.eup %1020 }
 0x197   :  { %v560_v39 = vmul.f32 %v1021_v37, %v542_v21 }
 0x198   :  { %v1023_v41 = vpop.eup %1022 }
 0x199   :  { %v562_v43 = vmul.f32 %v560_v39, %v522_v38  ;;  %v565_v44 = vmul.f32 %v560_v39, %v523_v40  ;;  %v561_v45 = vmul.f32 %v1023_v41, %v549_v25 }
 0x19b   :  { %v563_v47 = vmul.f32 %v561_v45, %v526_v42  ;;  %v566_v48 = vmul.f32 %v561_v45, %v527_v46 }
 0x19d   :  { %v564_v49 = vpack.c.bf16 %v563_v47, %v562_v43  ;;  %v567_v50 = vpack.c.bf16 %v566_v48, %v565_v44 }
 0x19f   :  { %899 = vmatmul.mubr.bf16.vlgmr.msra.gmra.mrb[4].mxu0 %v567_v50  ;;  %919 = vmatmul.mubr.bf16.vlgmr.msra.gmra.mrb[4].mxu1 %v564_v49 }
 0x272   :  { %v682_v51 = vpop.f32.mrb[4].mxu0  ;;  %v771_v52 = vpop.f32.mrb[4].mxu1 }
 0x273   :  { %v772_v54 = vadd.f32 %v771_v52, %v682_v51  ;;  %v900_v55 = vpop.f32.mrb[5].mxu0  ;;  %v920_v56 = vpop.f32.mrb[5].mxu1 }
 0x274   :  { %v685_v57 = vpop.f32.mrb[6].mxu0  ;;  %v774_v58 = vpop.f32.mrb[6].mxu1 }
 0x275   :  { %v785_v59 = vadd.f32 %v863_v53, %v772_v54  ;;  %v775_v60 = vadd.f32 %v774_v58, %v685_v57  ;;  %v901_v61 = vpop.f32.mrb[7].mxu0  ;;  %v921_v62 = vpop.f32.mrb[7].mxu1 }
 0x277   :  { %787 = vst [vmem:[#allocation13] sm:$0xff] %v785_v59  ;;  %v786_v63 = vadd.f32 %v863_v53, %v775_v60 }
 0x279   :  { %788 = vst [vmem:[#allocation13 + $0x8] sm:$0xff] %v786_v63 }
 0x27a   :  { %1167 = shalt.err (!%p1164_p10)
}
 0x27b   :  { %s1168_s18 = scalar_lea.hbm %s1373_s8, 256 }
 0x27c   :  { %p1169_p11 = scmp.ne.s32.totalorder %s1373_s8, %s1168_s18  ;;  %p1172_p12 = scmp.lt.u32.totalorder %s1168_s18, %s1373_s8 }
 0x27e   :  { %p1174_p13 = pnand %p1172_p12, %p1169_p11 }
 0x280   :  { %1177 = shalt.err (!%p1174_p13)
}
 0x281   :  { %s1202_s20 = smov 128   ;;  %s1203_s24 = smov 8  }
 0x282   :  { %800 = dma.vmem_to_hbm [thread:$0]  %s795_s22, 256, %s1373_s8, [#allocation4], %s1202_s20, %s1202_s20, %s1203_s24  }
 0x283   :  { %1186 = dma.done.wait [#allocation4], 256  }
 0x284   :  { %1187 = vsyncadd [#allocation4], 4294967040 }
 0x285   :  { %804 = vsyncpa [#allocation3], 1 }
 0x286   :  { %805 = vsyncpa [#allocation6], 1 }
 0x287   :  { %806 = vsyncpa [#allocation9], 1 }
 0x288   :  { %807 = vsyncpa [#allocation12], 1 }
 0x289   :  { %808 = vsyncpa [#allocation4], 1 }

// kernel: tpu_custom_call.1
= control target key start
LH: loop header
LB: loop body
LE: loop exit
PB: predicated region body
PF: predicated region fallthrough
CT: control target
= control target key end

     0   :  { %13 = vsyncpa [#allocation3], 0  ;;  %s1365_s0 = inlined_call_operand.hbm [shape: bf16[16,64], index: 0, kind: input, shape index: {}]   ;;  %s1366_s1 = inlined_call_operand.hbm [shape: bf16[16,64], index: 1, kind: input, shape index: {}]   ;;  %s1367_s2 = inlined_call_operand.hbm [shape: bf16[64,512], index: 2, kind: input, shape index: {}]   ;;  %s1368_s3 = inlined_call_operand.hbm [shape: bf16[64,512], index: 3, kind: input, shape index: {}]   ;;  %s1369_s4 = inlined_call_operand.vmem [shape: f32[1,512], index: 4, kind: input, shape index: {}]   ;;  %s1370_s5 = inlined_call_operand.hbm [shape: bf16[128,128], index: 5, kind: input, shape index: {}]   ;;  %s1371_s6 = inlined_call_operand.hbm [shape: bf16[128,128], index: 6, kind: input, shape index: {}]   ;;  %s1372_s7 = inlined_call_operand.vmem [shape: f32[1,128], index: 7, kind: input, shape index: {}]   ;;  %s1373_s8 = inlined_call_operand.hbm [shape: f32[16,128], index: 8, kind: output, shape index: {}]  }
   0x1   :  { %14 = vsyncpa [#allocation6], 0 }
   0x2   :  { %15 = vsyncpa [#allocation9], 0 }
   0x3   :  { %16 = vsyncpa [#allocation12], 0 }
   0x4   :  { %17 = vsyncpa [#allocation4], 0  ;;  %s1188_s27 = smov [#allocation5]   ;;  %s1024_s9 = scalar_lea.hbm %s1366_s1, 128 }
   0x5   :  { %s35_s28 = sshll.u32 %s1188_s27, 4  ;;  %p1025_p0 = scmp.ne.s32.totalorder %s1366_s1, %s1024_s9  ;;  %s36_s28 = int_to_ptr.vmem [resolvable:$true] %s35_s28 }
   0x6   :  { %p1028_p1 = scmp.lt.u32.totalorder %s1024_s9, %s1366_s1 }
   0x8   :  { %p1030_p2 = pnand %p1028_p1, %p1025_p0 }
   0xa   :  { %1033 = shalt.err (!%p1030_p2)
}
   0xb   :  { %s1034_s14 = scalar_lea.vmem %s36_s28, 128  ;;  %p1039_p4 = scmp.lt.s32.totalorder %s36_s28, %s36_s28 }
   0xc   :  { %p1035_p3 = scmp.ne.s32.totalorder %s36_s28, %s1034_s14  ;;  %p1040_p5 = scmp.lt.s32.totalorder %s1034_s14, %s1034_s14 }
   0xe   :  { %p1041_p6 = por %p1040_p5, %p1039_p4 }
  0x10   :  { %p1042_p7 = pnand %p1041_p6, %p1035_p3 }
  0x12   :  { %1045 = shalt.err (!%p1042_p7)
}
  0x13   :  { %s1189_s15 = smov 64   ;;  %s1190_s16 = smov 4  }
  0x14   :  { %41 = dma.hbm_to_vmem [thread:$0]  %s1366_s1, 128, %s36_s28, [#allocation6], %s1189_s15, %s1189_s15, %s1190_s16  }
  0x15   :  { %s1191_s19 = smov [#allocation8]   ;;  %s1192_s21 = smov [#allocation2]  }
  0x16   :  { %s59_s20 = sshll.u32 %s1191_s19, 4  ;;  %s23_s22 = sshll.u32 %s1192_s21, 4  ;;  %s60_s20 = int_to_ptr.vmem [resolvable:$true] %s59_s20  ;;  %s24_s22 = int_to_ptr.vmem [resolvable:$true] %s23_s22 }
  0x17   :  { %s1046_s25 = scalar_lea.hbm %s1368_s3, 2048 }
  0x18   :  { %p1047_p8 = scmp.ne.s32.totalorder %s1368_s3, %s1046_s25  ;;  %p1050_p9 = scmp.lt.u32.totalorder %s1046_s25, %s1368_s3 }
  0x1a   :  { %p1052_p10 = pnand %p1050_p9, %p1047_p8 }
  0x1c   :  { %1055 = shalt.err (!%p1052_p10)
}
  0x1d   :  { %s1056_s1 = scalar_lea.vmem %s60_s20, 2048  ;;  %p1061_p12 = scmp.lt.s32.totalorder %s60_s20, %s60_s20 }
  0x1e   :  { %p1057_p11 = scmp.ne.s32.totalorder %s60_s20, %s1056_s1  ;;  %p1062_p13 = scmp.lt.s32.totalorder %s1056_s1, %s1056_s1 }
  0x20   :  { %p1063_p0 = por %p1062_p13, %p1061_p12 }
  0x22   :  { %p1064_p1 = pnand %p1063_p0, %p1057_p11 }
  0x24   :  { %1067 = shalt.err (!%p1064_p1)
}
  0x25   :  { %s1193_s28 = smov 256   ;;  %s1194_s9 = smov 16  }
  0x26   :  { %65 = dma.hbm_to_vmem [thread:$0]  %s1368_s3, 2048, %s60_s20, [#allocation9], %s1193_s28, %s1193_s28, %s1194_s9  }
  0x27   :  { %s1068_s14 = scalar_lea.hbm %s1365_s0, 128 }
  0x28   :  { %p1069_p2 = scmp.ne.s32.totalorder %s1365_s0, %s1068_s14  ;;  %p1072_p3 = scmp.lt.u32.totalorder %s1068_s14, %s1365_s0 }
  0x2a   :  { %p1074_p4 = pnand %p1072_p3, %p1069_p2 }
  0x2c   :  { %1077 = shalt.err (!%p1074_p4)
}
  0x2d   :  { %s1078_s23 = scalar_lea.vmem %s24_s22, 128  ;;  %p1083_p6 = scmp.lt.s32.totalorder %s24_s22, %s24_s22 }
  0x2e   :  { %p1079_p5 = scmp.ne.s32.totalorder %s24_s22, %s1078_s23  ;;  %p1084_p7 = scmp.lt.s32.totalorder %s1078_s23, %s1078_s23 }
  0x30   :  { %p1085_p8 = por %p1084_p7, %p1083_p6 }
  0x32   :  { %p1086_p9 = pnand %p1085_p8, %p1079_p5 }
  0x34   :  { %1089 = shalt.err (!%p1086_p9)
}
  0x35   :  { %29 = dma.hbm_to_vmem [thread:$0]  %s1365_s0, 128, %s24_s22, [#allocation3], %s1189_s15, %s1189_s15, %s1190_s16  }
  0x36   :  { %s1195_s24 = smov [#allocation7]   ;;  %s1196_s26 = smov [#allocation10]  }
  0x37   :  { %s47_s25 = sshll.u32 %s1195_s24, 4  ;;  %s73_s27 = sshll.u32 %s1196_s26, 4  ;;  %s48_s25 = int_to_ptr.vmem [resolvable:$true] %s47_s25  ;;  %s74_s27 = int_to_ptr.vmem [resolvable:$true] %s73_s27 }
  0x38   :  { %s1090_s1 = scalar_lea.hbm %s1367_s2, 2048 }
  0x39   :  { %p1091_p10 = scmp.ne.s32.totalorder %s1367_s2, %s1090_s1  ;;  %p1094_p11 = scmp.lt.u32.totalorder %s1090_s1, %s1367_s2 }
  0x3b   :  { %p1096_p12 = pnand %p1094_p11, %p1091_p10 }
  0x3d   :  { %1099 = shalt.err (!%p1096_p12)
}
  0x3e   :  { %s1100_s0 = scalar_lea.vmem %s48_s25, 2048  ;;  %p1105_p0 = scmp.lt.s32.totalorder %s48_s25, %s48_s25 }
  0x3f   :  { %p1101_p13 = scmp.ne.s32.totalorder %s48_s25, %s1100_s0  ;;  %p1106_p1 = scmp.lt.s32.totalorder %s1100_s0, %s1100_s0 }
  0x41   :  { %p1107_p2 = por %p1106_p1, %p1105_p0 }
  0x43   :  { %p1108_p3 = pnand %p1107_p2, %p1101_p13 }
  0x45   :  { %1111 = shalt.err (!%p1108_p3)
}
  0x46   :  { %53 = dma.hbm_to_vmem [thread:$0]  %s1367_s2, 2048, %s48_s25, [#allocation6], %s1193_s28, %s1193_s28, %s1194_s9  }
  0x47   :  { %s1112_s19 = scalar_lea.hbm %s1370_s5, 1024 }
  0x48   :  { %p1113_p4 = scmp.ne.s32.totalorder %s1370_s5, %s1112_s19  ;;  %p1116_p5 = scmp.lt.u32.totalorder %s1112_s19, %s1370_s5 }
  0x4a   :  { %p1118_p6 = pnand %p1116_p5, %p1113_p4 }
  0x4c   :  { %1121 = shalt.err (!%p1118_p6)
}
  0x4d   :  { %s1122_s24 = scalar_lea.vmem %s74_s27, 1024  ;;  %p1127_p8 = scmp.lt.s32.totalorder %s74_s27, %s74_s27 }
  0x4e   :  { %p1123_p7 = scmp.ne.s32.totalorder %s74_s27, %s1122_s24  ;;  %p1128_p9 = scmp.lt.s32.totalorder %s1122_s24, %s1122_s24 }
  0x50   :  { %p1129_p10 = por %p1128_p9, %p1127_p8 }
  0x52   :  { %p1130_p11 = pnand %p1129_p10, %p1123_p7 }
  0x54   :  { %1133 = shalt.err (!%p1130_p11)
}
  0x55   :  { %79 = dma.hbm_to_vmem [thread:$0]  %s1370_s5, 1024, %s74_s27, [#allocation9], %s1189_s15, %s1189_s15, %s1190_s16  }
  0x56   :  { %s1197_s9 = smov [#allocation11]   ;;  %s1134_s30 = scalar_lea.hbm %s1371_s6, 1024 }
  0x57   :  { %s85_s25 = sshll.u32 %s1197_s9, 4  ;;  %p1135_p12 = scmp.ne.s32.totalorder %s1371_s6, %s1134_s30  ;;  %s86_s25 = int_to_ptr.vmem [resolvable:$true] %s85_s25 }
  0x58   :  { %p1138_p13 = scmp.lt.u32.totalorder %s1134_s30, %s1371_s6 }
  0x5a   :  { %p1140_p0 = pnand %p1138_p13, %p1135_p12 }
  0x5c   :  { %1143 = shalt.err (!%p1140_p0)
}
  0x5d   :  { %s1144_s13 = scalar_lea.vmem %s86_s25, 1024  ;;  %p1149_p2 = scmp.lt.s32.totalorder %s86_s25, %s86_s25 }
  0x5e   :  { %p1145_p1 = scmp.ne.s32.totalorder %s86_s25, %s1144_s13  ;;  %p1150_p3 = scmp.lt.s32.totalorder %s1144_s13, %s1144_s13 }
  0x60   :  { %p1151_p4 = por %p1150_p3, %p1149_p2 }
  0x62   :  { %p1152_p5 = pnand %p1151_p4, %p1145_p1 }
  0x64   :  { %1155 = shalt.err (!%p1152_p5)
}
  0x65   :  { %91 = dma.hbm_to_vmem [thread:$0]  %s1371_s6, 1024, %s86_s25, [#allocation12], %s1189_s15, %s1189_s15, %s1190_s16  }
  0x66   :  { %1178 = dma.done.wait [#allocation3], 128  }
  0x67   :  { %1179 = vsyncadd [#allocation3], 4294967168 }
  0x68   :  { %1180 = dma.done.wait [#allocation6], 2176  }
  0x69   :  { %1181 = vsyncadd [#allocation6], 4294965120 }
  0x6a   :  { %1182 = dma.done.wait [#allocation9], 3072  }
  0x6b   :  { %1183 = vsyncadd [#allocation9], 4294964224 }
  0x6c   :  { %1184 = dma.done.wait [#allocation12], 1024  }
  0x6d   :  { %1185 = vsyncadd [#allocation12], 4294966272  ;;  %v1198_v0 = vmov 0   ;;  %v946_v1 = vld [vmem:[#allocation8 + $0x4] ss:$16 sps:$4 sm:$0xff]   ;;  %v961_v10 = vld [vmem:[#allocation5] sm:$0xff]   ;;  %v500_v52 = vlaneseq }
  0x6e   :  { %270 = vmatprep.mubr.bf16.mxu0 %v1198_v0  ;;  %313 = vmatprep.mubr.bf16.mxu1 %v1198_v0  ;;  %v948_v2 = vld [vmem:[#allocation8] ss:$16 sps:$4 sm:$0xff]   ;;  %v949_v3 = vld [vmem:[#allocation8 + $0x24] ss:$16 sps:$4 sm:$0xff]   ;;  %v972_v11 = vld [vmem:[#allocation8 + $0xc] ss:$16 sps:$4 sm:$0xff]  }
  0x6f   :  { %238 = vmatprep.subr.bf16.mxu0 %v946_v1  ;;  %v951_v4 = vld [vmem:[#allocation8 + $0x20] ss:$16 sps:$4 sm:$0xff]   ;;  %v952_v5 = vld [vmem:[#allocation8 + $0x44] ss:$16 sps:$4 sm:$0xff]   ;;  %v974_v12 = vld [vmem:[#allocation8 + $0x8] ss:$16 sps:$4 sm:$0xff]   ;;  %281 = vmatprep.subr.bf16.mxu1 %v972_v11 }
  0x70   :  { %239 = vmatpush1.bf16.msra.mxu0 %v948_v2  ;;  %v954_v6 = vld [vmem:[#allocation8 + $0x40] ss:$16 sps:$4 sm:$0xff]   ;;  %v955_v7 = vld [vmem:[#allocation8 + $0x64] ss:$16 sps:$4 sm:$0xff]   ;;  %v975_v13 = vld [vmem:[#allocation8 + $0x2c] ss:$16 sps:$4 sm:$0xff]   ;;  %282 = vmatpush1.bf16.msra.mxu1 %v974_v12 }
  0x71   :  { %240 = vmatprep.subr.bf16.mxu0 %v949_v3  ;;  %v957_v8 = vld [vmem:[#allocation8 + $0x60] ss:$16 sps:$4 sm:$0xff]   ;;  %v960_v9 = vld [vmem:[#allocation7 + $0x4] ss:$16 sps:$4 sm:$0xff]   ;;  %vm234_vm0 = vcmask 523264   ;;  %283 = vmatprep.subr.bf16.mxu1 %v975_v13  ;;  %v1199_v37 = vmov 0.0  }
  0x72   :  { %v958_v14 = vld [vmem:[#allocation7] ss:$16 sps:$4 sm:$0xff]   ;;  %v964_v15 = vld [vmem:[#allocation7 + $0x24] ss:$16 sps:$4 sm:$0xff]   ;;  %v977_v16 = vld [vmem:[#allocation8 + $0x28] ss:$16 sps:$4 sm:$0xff]  }
  0x73   :  { %v978_v17 = vld [vmem:[#allocation8 + $0x4c] ss:$16 sps:$4 sm:$0xff]   ;;  %v962_v18 = vld [vmem:[#allocation7 + $0x20] ss:$16 sps:$4 sm:$0xff]   ;;  %v967_v19 = vld [vmem:[#allocation7 + $0x44] ss:$16 sps:$4 sm:$0xff]  }
  0x74   :  { %241 = vmatpush1.bf16.msra.mxu0 %v951_v4  ;;  %284 = vmatpush1.bf16.msra.mxu1 %v977_v16  ;;  %v980_v20 = vld [vmem:[#allocation8 + $0x48] ss:$16 sps:$4 sm:$0xff]   ;;  %v965_v21 = vld [vmem:[#allocation7 + $0x40] ss:$16 sps:$4 sm:$0xff]   ;;  %v981_v22 = vld [vmem:[#allocation8 + $0x6c] ss:$16 sps:$4 sm:$0xff]  }
  0x75   :  { %242 = vmatprep.subr.bf16.mxu0 %v952_v5  ;;  %285 = vmatprep.subr.bf16.mxu1 %v978_v17  ;;  %v970_v23 = vld [vmem:[#allocation7 + $0x64] ss:$16 sps:$4 sm:$0xff]   ;;  %v983_v24 = vld [vmem:[#allocation8 + $0x68] ss:$16 sps:$4 sm:$0xff]   ;;  %v986_v25 = vld [vmem:[#allocation7 + $0xc] ss:$16 sps:$4 sm:$0xff]  }
  0x76   :  { %v968_v26 = vld [vmem:[#allocation7 + $0x60] ss:$16 sps:$4 sm:$0xff]   ;;  %v984_v27 = vld [vmem:[#allocation7 + $0x8] ss:$16 sps:$4 sm:$0xff]   ;;  %v989_v28 = vld [vmem:[#allocation7 + $0x2c] ss:$16 sps:$4 sm:$0xff]  }
  0x77   :  { %v971_v29 = vld [vmem:[#allocation2] sm:$0xff]   ;;  %v987_v30 = vld [vmem:[#allocation7 + $0x28] ss:$16 sps:$4 sm:$0xff]   ;;  %v992_v31 = vld [vmem:[#allocation7 + $0x4c] ss:$16 sps:$4 sm:$0xff]   ;;  %vm1200_vm1 = vmmov 0  }
  0x78   :  { %243 = vmatpush1.bf16.msra.mxu0 %v954_v6  ;;  %286 = vmatpush1.bf16.msra.mxu1 %v980_v20  ;;  %v990_v32 = vld [vmem:[#allocation7 + $0x48] ss:$16 sps:$4 sm:$0xff]   ;;  %v995_v33 = vld [vmem:[#allocation7 + $0x6c] ss:$16 sps:$4 sm:$0xff]   ;;  %v996_v35 = vld [vmem:[#allocation11] sm:$0xff]   ;;  %v501_v53 = vshrl.u32 %v500_v52, 7 }
  0x79   :  { %244 = vmatprep.subr.bf16.mxu0 %v955_v7  ;;  %287 = vmatprep.subr.bf16.mxu1 %v981_v22  ;;  %v993_v34 = vld [vmem:[#allocation7 + $0x68] ss:$16 sps:$4 sm:$0xff]   ;;  %v997_v36 = vld [vmem:[#allocation10] sm:$0xff]   ;;  %v1000_v40 = vld [vmem:[#allocation11 + $0x10] sm:$0xff]   ;;  %s1201_s0 = smov [#allocation13]  }
  0x7a   :  { %v998_v38 = vld [vmem:[#allocation11 + $0x8] sm:$0xff]   ;;  %v1001_v41 = vld [vmem:[#allocation10 + $0x10] sm:$0xff]   ;;  %v1002_v42 = vld [vmem:[#allocation11 + $0x18] sm:$0xff]   ;;  %v502_v54 = vsub.s32 0, %v501_v53  ;;  %v506_v56 = vsub.s32 1, %v501_v53  ;;  %s794_s22 = sshll.u32 %s1201_s0, 4  ;;  %s795_s22 = int_to_ptr.vmem [resolvable:$true] %s794_s22 }
  0x7b   :  { %v999_v39 = vld [vmem:[#allocation10 + $0x8] sm:$0xff]   ;;  %v1003_v43 = vld [vmem:[#allocation10 + $0x18] sm:$0xff]   ;;  %v1004_v44 = vld [vmem:[#allocation11 + $0x20] sm:$0xff]   ;;  %s1156_s14 = scalar_lea.vmem %s795_s22, 256  ;;  %p1161_p7 = scmp.lt.s32.totalorder %s795_s22, %s795_s22 }
  0x7c   :  { %245 = vmatpush1.bf16.msra.mxu0 %v957_v8  ;;  %288 = vmatpush1.bf16.msra.mxu1 %v983_v24  ;;  %v1005_v45 = vld [vmem:[#allocation10 + $0x20] sm:$0xff]   ;;  %v1006_v46 = vld [vmem:[#allocation11 + $0x28] sm:$0xff]   ;;  %v1008_v48 = vld [vmem:[#allocation11 + $0x30] sm:$0xff]   ;;  %p1157_p6 = scmp.ne.s32.totalorder %s795_s22, %s1156_s14  ;;  %p1162_p8 = scmp.lt.s32.totalorder %s1156_s14, %s1156_s14 }
  0x7d   :  { %412 = vmatprep.subr.bf16.mxu0 %v960_v9  ;;  %455 = vmatprep.subr.bf16.mxu1 %v986_v25  ;;  %v1007_v47 = vld [vmem:[#allocation10 + $0x28] sm:$0xff]   ;;  %v1009_v49 = vld [vmem:[#allocation10 + $0x30] sm:$0xff]   ;;  %v1010_v50 = vld [vmem:[#allocation11 + $0x38] sm:$0xff]  }
  0x7e   :  { %v1011_v51 = vld [vmem:[#allocation10 + $0x38] sm:$0xff]   ;;  %v498_v55 = vld [vmem:[%s1369_s4] sm:$0xf]  ;;  %p1163_p9 = por %p1162_p8, %p1161_p7 }
  0x7f   :  { %826 = vmatmul.mubr.msk.bf16.vlgmr.msra.gmra.mrb[0].mxu0 %vm234_vm0, %v961_v10  ;;  %827 = vmatmul.mubr.msk.bf16.vlgmr.msra.gmra.mrb[0].mxu1 %vm234_vm0, %v961_v10  ;;  %v503_v57 = vrot.slane %v498_v55, %v502_v54  ;;  %v507_v58 = vrot.slane %v498_v55, %v506_v56 }
  0x80   :  { %413 = vmatpush1.bf16.msra.mxu0 %v958_v14  ;;  %444 = vmatprep.mubr.bf16.mxu0 %v1198_v0  ;;  %p1164_p10 = pnand %p1163_p9, %p1157_p6 }
  0x81   :  { %414 = vmatprep.subr.bf16.mxu0 %v964_v15  ;;  %456 = vmatpush1.bf16.msra.mxu1 %v984_v27 }
  0x82   :  { %487 = vmatprep.mubr.bf16.mxu1 %v1198_v0  ;;  %457 = vmatprep.subr.bf16.mxu1 %v989_v28 }
  0x84   :  { %415 = vmatpush1.bf16.msra.mxu0 %v962_v18 }
  0x85   :  { %416 = vmatprep.subr.bf16.mxu0 %v967_v19  ;;  %458 = vmatpush1.bf16.msra.mxu1 %v987_v30 }
  0x86   :  { %459 = vmatprep.subr.bf16.mxu1 %v992_v31 }
  0x88   :  { %417 = vmatpush1.bf16.msra.mxu0 %v965_v21 }
  0x89   :  { %418 = vmatprep.subr.bf16.mxu0 %v970_v23  ;;  %460 = vmatpush1.bf16.msra.mxu1 %v990_v32 }
  0x8a   :  { %461 = vmatprep.subr.bf16.mxu1 %v995_v33  ;;  %v510_v33 = vsub.s32 2, %v501_v53 }
  0x8c   :  { %419 = vmatpush1.bf16.msra.mxu0 %v968_v26 }
  0x8d   :  { %462 = vmatpush1.bf16.msra.mxu1 %v993_v34  ;;  %882 = vmatprep.subr.bf16.mxu0 %v1199_v37  ;;  %v514_v34 = vsub.s32 3, %v501_v53  ;;  %v863_v53 = vld [vmem:[%s1372_s7] ss:$0 sm:$0xff] }
  0x8e   :  { %902 = vmatprep.subr.bf16.mxu1 %v1199_v37 }
  0x8f   :  { %845 = vmatmul.mubr.msk.bf16.vlgmr.msra.gmra.mrb[0].mxu0 %vm234_vm0, %v971_v29 }
  0x90   :  { %846 = vmatmul.mubr.msk.bf16.vlgmr.msra.gmra.mrb[0].mxu1 %vm234_vm0, %v971_v29  ;;  %883 = vmatpush3.bf16.msra.mxu0 %v996_v35  ;;  %v511_v35 = vrot.slane %v498_v55, %v510_v33 }
  0x91   :  { %903 = vmatpush3.bf16.msra.mxu1 %v997_v36  ;;  %884 = vmatprep.subr.bf16.mxu0 %v1199_v37  ;;  %v515_v36 = vrot.slane %v498_v55, %v514_v34 }
  0x92   :  { %904 = vmatprep.subr.bf16.mxu1 %v1199_v37  ;;  %898 = vmatprep.mubr.msk.bf16.mxu0 %vm1200_vm1, %v1199_v37 }
  0x93   :  { %918 = vmatprep.mubr.msk.bf16.mxu1 %vm1200_vm1, %v1199_v37 }
  0x94   :  { %885 = vmatpush3.bf16.msra.mxu0 %v998_v38 }
  0x95   :  { %905 = vmatpush3.bf16.msra.mxu1 %v999_v39  ;;  %886 = vmatprep.subr.bf16.mxu0 %v1199_v37 }
  0x96   :  { %906 = vmatprep.subr.bf16.mxu1 %v1199_v37 }
  0x98   :  { %887 = vmatpush3.bf16.msra.mxu0 %v1000_v40 }
  0x99   :  { %907 = vmatpush3.bf16.msra.mxu1 %v1001_v41  ;;  %888 = vmatprep.subr.bf16.mxu0 %v1199_v37 }
  0x9a   :  { %908 = vmatprep.subr.bf16.mxu1 %v1199_v37 }
  0x9c   :  { %889 = vmatpush3.bf16.msra.mxu0 %v1002_v42 }
  0x9d   :  { %909 = vmatpush3.bf16.msra.mxu1 %v1003_v43  ;;  %890 = vmatprep.subr.bf16.mxu0 %v1199_v37 }
  0x9e   :  { %910 = vmatprep.subr.bf16.mxu1 %v1199_v37 }
  0xa0   :  { %891 = vmatpush3.bf16.msra.mxu0 %v1004_v44 }
  0xa1   :  { %911 = vmatpush3.bf16.msra.mxu1 %v1005_v45  ;;  %892 = vmatprep.subr.bf16.mxu0 %v1199_v37 }
  0xa2   :  { %912 = vmatprep.subr.bf16.mxu1 %v1199_v37 }
  0xa4   :  { %893 = vmatpush3.bf16.msra.mxu0 %v1006_v46 }
  0xa5   :  { %913 = vmatpush3.bf16.msra.mxu1 %v1007_v47  ;;  %894 = vmatprep.subr.bf16.mxu0 %v1199_v37 }
  0xa6   :  { %914 = vmatprep.subr.bf16.mxu1 %v1199_v37 }
  0xa8   :  { %895 = vmatpush3.bf16.msra.mxu0 %v1008_v48 }
  0xa9   :  { %915 = vmatpush3.bf16.msra.mxu1 %v1009_v49  ;;  %896 = vmatprep.subr.bf16.mxu0 %v1199_v37 }
  0xaa   :  { %916 = vmatprep.subr.bf16.mxu1 %v1199_v37 }
  0xac   :  { %897 = vmatpush3.bf16.msra.mxu0 %v1010_v50 }
  0xad   :  { %917 = vmatpush3.bf16.msra.mxu1 %v1011_v51 }
 0x162   :  { %v446_v59 = vpop.f32.mrb[0].mxu0 }
 0x163   :  { %v520_v60 = vadd.f32 %v503_v57, %v446_v59  ;;  %v448_v61 = vpop.f32.mrb[1].mxu0  ;;  %v489_v11 = vpop.f32.mrb[0].mxu1 }
 0x164   :  { %v521_v62 = vadd.f32 %v507_v58, %v448_v61  ;;  %v450_v63 = vpop.f32.mrb[2].mxu0  ;;  %v491_v12 = vpop.f32.mrb[1].mxu1  ;;  %v522_v38 = vadd.f32 %v511_v35, %v489_v11 }
 0x165   :  { %v528_v0 = vmul.f32 %v520_v60, %v520_v60  ;;  %v524_v1 = vadd.f32 %v503_v57, %v450_v63  ;;  %v452_v2 = vpop.f32.mrb[3].mxu0  ;;  %v493_v13 = vpop.f32.mrb[2].mxu1  ;;  %v523_v40 = vadd.f32 %v515_v36, %v491_v12 }
 0x166   :  { %v530_v3 = vmul.f32 %v521_v62, %v521_v62  ;;  %v525_v4 = vadd.f32 %v507_v58, %v452_v2  ;;  %v495_v14 = vpop.f32.mrb[3].mxu1  ;;  %v526_v42 = vadd.f32 %v511_v35, %v493_v13 }
 0x167   :  { %v529_v5 = vmul.f32 %v524_v1, %v524_v1  ;;  %v527_v46 = vadd.f32 %v515_v36, %v495_v14 }
 0x168   :  { %v532_v6 = vadd.f32 %v530_v3, %v528_v0  ;;  %v531_v7 = vmul.f32 %v525_v4, %v525_v4 }
 0x16a   :  { %v534_v8 = vadd.f32 1e-08, %v532_v6  ;;  %v533_v9 = vadd.f32 %v531_v7, %v529_v5 }
 0x16c   :  { %1012 = vrsqrt.f32 %v534_v8  ;;  %v535_v10 = vadd.f32 1e-08, %v533_v9  ;;  %vm538_vm2 = vcmp.eq.f32.partialorder %v534_v8, inf  ;;  %v541_v18 = vand.u32 2147483648, %v534_v8 }
 0x16d   :  { %vm540_vm3 = vcmp.eq.f32.partialorder %v534_v8, 0.0 }
 0x16e   :  { %1014 = vrsqrt.f32 %v535_v10  ;;  %vm545_vm4 = vcmp.eq.f32.partialorder %v535_v10, inf  ;;  %v548_v22 = vand.u32 2147483648, %v535_v10  ;;  %vm547_vm5 = vcmp.eq.f32.partialorder %v535_v10, 0.0 }
 0x176   :  { %v1013_v15 = vpop.eup %1012 }
 0x177   :  { %v537_v16 = vmul.f32 %v1013_v15, %v534_v8 }
 0x178   :  { %v1015_v17 = vpop.eup %1014 }
 0x179   :  { %v539_v19 = vsel %vm538_vm2, %v534_v8, %v537_v16  ;;  %v544_v20 = vmul.f32 %v1015_v17, %v535_v10 }
 0x17a   :  { %v542_v21 = vsel %vm540_vm3, %v541_v18, %v539_v19 }
 0x17b   :  { %v550_v23 = vsub.f32 0.0, %v542_v21  ;;  %v546_v24 = vsel %vm545_vm4, %v535_v10, %v544_v20 }
 0x17c   :  { %v549_v25 = vsel %vm547_vm5, %v548_v22, %v546_v24 }
 0x17d   :  { %v552_v26 = vmul.f32 1.442695, %v550_v23  ;;  %v551_v27 = vsub.f32 0.0, %v549_v25 }
 0x17f   :  { %1016 = vpow2.f32 %v552_v26  ;;  %v554_v28 = vmul.f32 1.442695, %v551_v27 }
 0x181   :  { %1018 = vpow2.f32 %v554_v28 }
 0x189   :  { %v1017_v29 = vpop.eup %1016 }
 0x18a   :  { %v556_v30 = vadd.f32 1.0, %v1017_v29 }
 0x18b   :  { %v1019_v31 = vpop.eup %1018 }
 0x18c   :  { %1020 = vrcp.f32 %v556_v30  ;;  %v557_v32 = vadd.f32 1.0, %v1019_v31 }
 0x18e   :  { %1022 = vrcp.f32 %v557_v32 }
 0x196   :  { %v1021_v37 = vpop.eup %1020 }
 0x197   :  { %v560_v39 = vmul.f32 %v1021_v37, %v542_v21 }
 0x198   :  { %v1023_v41 = vpop.eup %1022 }
 0x199   :  { %v562_v43 = vmul.f32 %v560_v39, %v522_v38  ;;  %v565_v44 = vmul.f32 %v560_v39, %v523_v40  ;;  %v561_v45 = vmul.f32 %v1023_v41, %v549_v25 }
 0x19b   :  { %v563_v47 = vmul.f32 %v561_v45, %v526_v42  ;;  %v566_v48 = vmul.f32 %v561_v45, %v527_v46 }
 0x19d   :  { %v564_v49 = vpack.c.bf16 %v563_v47, %v562_v43  ;;  %v567_v50 = vpack.c.bf16 %v566_v48, %v565_v44 }
 0x19f   :  { %899 = vmatmul.mubr.bf16.vlgmr.msra.gmra.mrb[4].mxu0 %v567_v50  ;;  %919 = vmatmul.mubr.bf16.vlgmr.msra.gmra.mrb[4].mxu1 %v564_v49 }
 0x272   :  { %v682_v51 = vpop.f32.mrb[4].mxu0  ;;  %v771_v52 = vpop.f32.mrb[4].mxu1 }
 0x273   :  { %v772_v54 = vadd.f32 %v771_v52, %v682_v51  ;;  %v900_v55 = vpop.f32.mrb[5].mxu0  ;;  %v920_v56 = vpop.f32.mrb[5].mxu1 }
 0x274   :  { %v685_v57 = vpop.f32.mrb[6].mxu0  ;;  %v774_v58 = vpop.f32.mrb[6].mxu1 }
 0x275   :  { %v785_v59 = vadd.f32 %v863_v53, %v772_v54  ;;  %v775_v60 = vadd.f32 %v774_v58, %v685_v57  ;;  %v901_v61 = vpop.f32.mrb[7].mxu0  ;;  %v921_v62 = vpop.f32.mrb[7].mxu1 }
 0x277   :  { %787 = vst [vmem:[#allocation13] sm:$0xff] %v785_v59  ;;  %v786_v63 = vadd.f32 %v863_v53, %v775_v60 }
 0x279   :  { %788 = vst [vmem:[#allocation13 + $0x8] sm:$0xff] %v786_v63 }
 0x27a   :  { %1167 = shalt.err (!%p1164_p10)
}
 0x27b   :  { %s1168_s18 = scalar_lea.hbm %s1373_s8, 256 }
 0x27c   :  { %p1169_p11 = scmp.ne.s32.totalorder %s1373_s8, %s1168_s18  ;;  %p1172_p12 = scmp.lt.u32.totalorder %s1168_s18, %s1373_s8 }
 0x27e   :  { %p1174_p13 = pnand %p1172_p12, %p1169_p11 }
 0x280   :  { %1177 = shalt.err (!%p1174_p13)
}
 0x281   :  { %s1202_s20 = smov 128   ;;  %s1203_s24 = smov 8  }
 0x282   :  { %800 = dma.vmem_to_hbm [thread:$0]  %s795_s22, 256, %s1373_s8, [#allocation4], %s1202_s20, %s1202_s20, %s1203_s24  }
 0x283   :  { %1186 = dma.done.wait [#allocation4], 256  }
 0x284   :  { %1187 = vsyncadd [#allocation4], 4294967040 }
 0x285   :  { %804 = vsyncpa [#allocation3], 1 }
 0x286   :  { %805 = vsyncpa [#allocation6], 1 }
 0x287   :  { %806 = vsyncpa [#allocation9], 1 }
 0x288   :  { %807 = vsyncpa [#allocation12], 1 }
 0x289   :  { %808 = vsyncpa [#allocation4], 1 }

</bundles_post_ra>
